<compile_context>
chip_gen: v7x
topology: tpu7x:2x2x1
jax: 0.10.0
libtpu: 0.0.40
codegen_flags: <defaults>
</compile_context>

<pallas_src>
import functools

import numpy as np
import jax
import jax.numpy as jnp
from jax import lax
from jax.experimental import pallas as pl
from jax.experimental.pallas import tpu as pltpu


def _round_up(x, m):
    return (x + m - 1) // m * m


# ---------------------------------------------------------------------------
# Fused kernel: per-chunk input projection -> serial LSTM recurrence
#               -> (last chunk) relu + packed FiLM projection epilogue.
# Grid: (batch_shards [parallel], time_chunks [arbitrary]).
# ---------------------------------------------------------------------------
def _film_lstm_kernel(x_ref, wih_ref, whh_ref, b_ref, wall_ref, ball_ref,
                      o_ref, xg_sc, h_sc, c_sc, *,
                      chunk_T, last_T, num_chunks, Bb, Hp, unroll):
    k = pl.program_id(1)                      # time-chunk index

    # (Re)initialize the recurrent state at the first chunk of each shard.
    @pl.when(k == 0)
    def _():
        h_sc[...] = jnp.zeros_like(h_sc)
        c_sc[...] = jnp.zeros_like(c_sc)

    # Hoisted input projection for this chunk: one MXU pass (bf16 operands,
    # f32 accumulation), bias folded in.  x_ref is (chunk_T*Bb, D).
    xg_sc[...] = (jnp.dot(x_ref[...], wih_ref[...],
                          preferred_element_type=jnp.float32)
                  + b_ref[...])

    whh = whh_ref[...]                        # (Hp, 4Hp), stays resident

    def step(t, carry):
        h, c = carry
        row = pl.multiple_of(t * Bb, 8)       # sublane-aligned dynamic slice
        gates = (xg_sc[pl.ds(row, Bb), :]
                 + jnp.dot(h.astype(whh.dtype), whh,
                           preferred_element_type=jnp.float32))   # (Bb, 4Hp)
        # Gate columns pre-permuted to [i, f, o, g]: one sigmoid over the
        # first 3*Hp lanes, one tanh over the last Hp lanes.
        sig = jax.nn.sigmoid(gates[:, :3 * Hp])
        g_g = jnp.tanh(gates[:, 3 * Hp:])
        i_g = sig[:, 0 * Hp:1 * Hp]
        f_g = sig[:, 1 * Hp:2 * Hp]
        o_g = sig[:, 2 * Hp:3 * Hp]
        c_new = f_g * c + i_g * g_g
        h_new = o_g * jnp.tanh(c_new)
        return h_new, c_new

    def run_steps(n):
        h, c = lax.fori_loop(0, n, step, (h_sc[...], c_sc[...]),
                             unroll=max(1, min(n, unroll)))
        h_sc[...] = h
        c_sc[...] = c

    if last_T == chunk_T:                     # T divides evenly into chunks
        run_steps(chunk_T)
    else:
        @pl.when(k < num_chunks - 1)
        def _():
            run_steps(chunk_T)

        @pl.when(k == num_chunks - 1)
        def _():
            run_steps(last_T)

    # Epilogue on the last chunk: fused relu(hn) + ALL gamma/beta Linears as
    # one lane-dense matmul.
    @pl.when(k == num_chunks - 1)
    def _():
        hn = jnp.maximum(h_sc[...], 0.0)
        o_ref[...] = (jnp.dot(hn.astype(wall_ref.dtype), wall_ref[...],
                              preferred_element_type=jnp.float32)
                      + ball_ref[...])


# ---------------------------------------------------------------------------
# Wrapper: weight packing (gate reorder + lane/sublane padding), chunking,
# optional batch sharding, and the pallas_call.
# ---------------------------------------------------------------------------
def film_lstm_fused(x, w_ih, w_hh, b, w_all, b_all, *,
                    matmul_dtype=jnp.bfloat16, max_chunk_T=64,
                    batch_shards=None, unroll=8):
    """x: (T,B,D); w_ih: (D,4H); w_hh: (H,4H); b = b_ih+b_hh: (1,4H) in
    PyTorch [i,f,g,o] column order; w_all/b_all: packed FiLM projection.
    Returns the packed (B, total) projection (gamma/beta columns)."""
    T, B, D = x.shape
    H = w_hh.shape[0]
    total = w_all.shape[1]

    Hp = _round_up(H, 128)              # lane-dense hidden / per-gate width
    Bp = _round_up(B, 8)                # sublane-aligned batch
    total_pad = _round_up(total, 128)   # lane-dense output width

    if batch_shards is None:            # use both TCs on v7x when batch allows
        batch_shards = 2 if (Bp >= 16 and Bp % 16 == 0) else 1
    S = batch_shards
    assert Bp % S == 0 and (Bp // S) % 8 == 0
    Bb = Bp // S

    chunk_T = min(T, max_chunk_T)
    num_chunks = int(pl.cdiv(T, chunk_T))
    Tp = num_chunks * chunk_T
    last_T = T - (num_chunks - 1) * chunk_T
    chunk_rows = chunk_T * Bb

    # ---- weight packing: permute PyTorch [i,f,g,o] columns to [i,f,o,g] and
    # zero-pad H -> Hp (padded gates stay exactly 0 through the recurrence).
    def pack_gate_cols(w, dtype):
        rows = w.shape[0]
        out = jnp.zeros((rows, 4 * Hp), dtype)
        blocks = (w[:, 0:H], w[:, H:2 * H], w[:, 3 * H:4 * H], w[:, 2 * H:3 * H])
        for gi, blk in enumerate(blocks):   # i, f, o, g
            out = out.at[:, gi * Hp:gi * Hp + H].set(blk.astype(dtype))
        return out

    wih_p = pack_gate_cols(w_ih, matmul_dtype)                       # (D, 4Hp)
    whh_p = jnp.zeros((Hp, 4 * Hp), matmul_dtype).at[:H, :].set(
        pack_gate_cols(w_hh, matmul_dtype))                          # (Hp, 4Hp)
    b_p = pack_gate_cols(b, jnp.float32)                             # (1, 4Hp)
    wall_p = jnp.zeros((Hp, total_pad), matmul_dtype).at[:H, :total].set(
        w_all.astype(matmul_dtype))                                  # (Hp, Tp)
    ball_p = jnp.zeros((1, total_pad), jnp.float32).at[:, :total].set(b_all)

    # ---- x layout: (S, Tp*Bb, D), shard-major; skip the pad copy when the
    # shapes are already aligned (pure reshape then).
    xd = x.astype(matmul_dtype)
    if B != Bp or T != Tp:
        xd = jnp.zeros((Tp, Bp, D), matmul_dtype).at[:T, :B, :].set(xd)
    if S == 1:
        x_p = xd.reshape(1, Tp * Bp, D)
    else:
        x_p = xd.reshape(Tp, S, Bb, D).transpose(1, 0, 2, 3).reshape(S, Tp * Bb, D)

    # ---- generation-aware VMEM budget.
    mm_bytes = jnp.dtype(matmul_dtype).itemsize
    working_set = (
        2 * chunk_rows * D * mm_bytes                                 # x (dbl-buf)
        + 2 * (D * 4 * Hp + Hp * 4 * Hp + Hp * total_pad) * mm_bytes  # weights
        + 2 * (4 * Hp + total_pad) * 4                                # biases
        + 2 * Bb * total_pad * 4                                      # output
        + chunk_rows * 4 * Hp * 4 + 2 * Bb * Hp * 4)                  # scratch
    try:
        vmem_cap = int(pltpu.get_tpu_info().vmem_capacity_bytes)
    except Exception:
        vmem_cap = 64 * 1024 * 1024      # conservative (v7x per-core) fallback
    vmem_limit = int(min(max(2 * working_set, 32 * 1024 * 1024),
                         int(vmem_cap * 0.8)))

    flops = 2 * (Tp * Bp * D * 4 * Hp          # input projection
                 + T * Bp * Hp * 4 * Hp        # recurrent matmuls
                 + Bp * Hp * total_pad)        # FiLM projection
    transcendentals = T * Bp * 5 * Hp          # sigmoid(3Hp)+tanh(Hp)+tanh(c)
    bytes_accessed = (mm_bytes * (Tp * Bp * D + D * 4 * Hp + Hp * 4 * Hp
                                  + Hp * total_pad)
                      + 4 * (4 * Hp + total_pad + Bp * total_pad))

    kernel = functools.partial(
        _film_lstm_kernel, chunk_T=chunk_T, last_T=last_T,
        num_chunks=num_chunks, Bb=Bb, Hp=Hp, unroll=unroll)

    proj_pad = pl.pallas_call(
        kernel,
        out_shape=jax.ShapeDtypeStruct((Bp, total_pad), jnp.float32),
        grid=(S, num_chunks),
        in_specs=[
            pl.BlockSpec((None, chunk_rows, D), lambda s, k: (s, k, 0)),  # x
            pl.BlockSpec((D, 4 * Hp), lambda s, k: (0, 0)),               # W_ih
            pl.BlockSpec((Hp, 4 * Hp), lambda s, k: (0, 0)),              # W_hh
            pl.BlockSpec((1, 4 * Hp), lambda s, k: (0, 0)),               # bias
            pl.BlockSpec((Hp, total_pad), lambda s, k: (0, 0)),           # W_all
            pl.BlockSpec((1, total_pad), lambda s, k: (0, 0)),            # b_all
        ],
        out_specs=pl.BlockSpec((Bb, total_pad), lambda s, k: (s, 0)),
        scratch_shapes=[
            pltpu.VMEM((chunk_rows, 4 * Hp), jnp.float32),   # xg (one chunk)
            pltpu.VMEM((Bb, Hp), jnp.float32),               # h carry
            pltpu.VMEM((Bb, Hp), jnp.float32),               # c carry
        ],
        compiler_params=pltpu.CompilerParams(
            dimension_semantics=("parallel", "arbitrary"),
            vmem_limit_bytes=vmem_limit),
        cost_estimate=pl.CostEstimate(flops=flops,
                                      transcendentals=transcendentals,
                                      bytes_accessed=bytes_accessed),
    )(x_p, wih_p, whh_p, b_p, wall_p, ball_p)

    return proj_pad[:B, :total]


# ---------------------------------------------------------------------------
# Full FiLM_LSTM forward (plain-JAX glue: split packed proj into gamma/beta).
# ---------------------------------------------------------------------------
def film_lstm_forward(x, params, output_shapes, **kw):
    B = x.shape[1]
    proj = film_lstm_fused(x, params["w_ih"], params["w_hh"], params["b"],
                           params["w_all"], params["b_all"], **kw)   # (B,total)
    out = []
    off = 0
    for shape in output_shapes:
        n = int(np.prod(shape))
        gamma = proj[:, off:off + n].reshape(1, B, n)   # matches hn's (1,B,.) lead
        off += n
        beta = proj[:, off:off + n].reshape(1, B, n)
        off += n
        out.append((gamma, beta))
    return out


# ---------------------------------------------------------------------------
# Pure-JAX reference for correctness checking (PyTorch [i,f,g,o] gate order).
# ---------------------------------------------------------------------------
def reference_forward(x, params, output_shapes):
    T, B, D = x.shape
    H = params["w_hh"].shape[0]

    def step(carry, x_t):
        h, c = carry
        gates = x_t @ params["w_ih"] + h @ params["w_hh"] + params["b"][0]
        i = jax.nn.sigmoid(gates[:, :H])
        f = jax.nn.sigmoid(gates[:, H:2 * H])
        g = jnp.tanh(gates[:, 2 * H:3 * H])
        o = jax.nn.sigmoid(gates[:, 3 * H:])
        c = f * c + i * g
        h = o * jnp.tanh(c)
        return (h, c), None

    (h, _), _ = lax.scan(step,
                         (jnp.zeros((B, H), jnp.float32),
                          jnp.zeros((B, H), jnp.float32)), x)
    hn = jnp.maximum(h, 0.0)
    proj = hn @ params["w_all"] + params["b_all"][0]
    out = []
    off = 0
    for shape in output_shapes:
        n = int(np.prod(shape))
        gamma = proj[:, off:off + n].reshape(1, B, n)
        off += n
        beta = proj[:, off:off + n].reshape(1, B, n)
        off += n
        out.append((gamma, beta))
    return out


if __name__ == "__main__":
    output_shapes = [(4, 8, 8), (2, 4, 4)]          # FiLM-conditioned conv layers
    total = int(sum(2 * np.prod(s) for s in output_shapes))

    def make_params(key, D, H):
        keys = jax.random.split(key, 5)
        scale = 1.0 / np.sqrt(H)
        return {
            # b = b_ih + b_hh when importing real nn.LSTM weights; [i,f,g,o] order.
            "w_ih":  jax.random.uniform(keys[0], (D, 4 * H), jnp.float32, -scale, scale),
            "w_hh":  jax.random.uniform(keys[1], (H, 4 * H), jnp.float32, -scale, scale),
            "b":     jax.random.uniform(keys[2], (1, 4 * H), jnp.float32, -scale, scale),
            "w_all": jax.random.uniform(keys[3], (H, total), jnp.float32, -scale, scale),
            "b_all": jax.random.uniform(keys[4], (1, total), jnp.float32, -scale, scale),
        }

    key = jax.random.PRNGKey(0)
    k1, k2, k3, k4 = jax.random.split(key, 4)

    # --- test 1: toy module-consistent shapes, f32 matmul path, tight tol ---
    T, B, D, H = 8, 2, 16, 32
    params = make_params(k1, D, H)
    x = jax.random.normal(k2, (T, B, D), jnp.float32)
    out = jax.block_until_ready(
        film_lstm_forward(x, params, output_shapes, matmul_dtype=jnp.float32))
    ref = reference_forward(x, params, output_shapes)
    for (g, b_), (gr, br) in zip(out, ref):
        np.testing.assert_allclose(np.asarray(g), np.asarray(gr), atol=1e-4, rtol=1e-4)
        np.testing.assert_allclose(np.asarray(b_), np.asarray(br), atol=1e-4, rtol=1e-4)

    # --- test 2: bf16 MXU path + time-chunked grid (partial last chunk) +
    #             2-way batch shard (parallel grid axis) ---
    T2, B2 = 12, 16
    params2 = make_params(k3, D, H)
    x2 = jax.random.normal(k4, (T2, B2, D), jnp.float32)
    out2 = jax.block_until_ready(
        film_lstm_forward(x2, params2, output_shapes,
                          matmul_dtype=jnp.bfloat16, max_chunk_T=8))
    ref2 = reference_forward(x2, params2, output_shapes)
    for (g, b_), (gr, br) in zip(out2, ref2):
        np.testing.assert_allclose(np.asarray(g), np.asarray(gr), atol=5e-2, rtol=5e-2)
        np.testing.assert_allclose(np.asarray(b_), np.asarray(br), atol=5e-2, rtol=5e-2)

    print("KERNEL_OK")
</pallas_src>

<mosaic_0001>
module attributes {stable_mosaic.version = 11 : i64} {
  func.func @_film_lstm_kernel(%arg0: i32, %arg1: i32, %arg2: memref<1x64x16xf32, #tpu.memory_space<vmem>>, %arg3: memref<16x512xf32, #tpu.memory_space<vmem>>, %arg4: memref<128x512xf32, #tpu.memory_space<vmem>>, %arg5: memref<1x512xf32, #tpu.memory_space<vmem>>, %arg6: memref<128x640xf32, #tpu.memory_space<vmem>>, %arg7: memref<1x640xf32, #tpu.memory_space<vmem>>, %arg8: memref<8x640xf32, #tpu.memory_space<vmem>>, %arg9: memref<64x512xf32, #tpu.memory_space<vmem>>, %arg10: memref<8x128xf32, #tpu.memory_space<vmem>>, %arg11: memref<8x128xf32, #tpu.memory_space<vmem>>) attributes {dimension_semantics = [#tpu.dimension_semantics<parallel>, #tpu.dimension_semantics<arbitrary>], iteration_bounds = array<i64: 1, 1>, scalar_prefetch = 0 : i64, scratch_operands = 3 : i64, tpu.core_type = #tpu.core_type<tc>, window_params = [{transform_indices = @transform_0, window_bounds = array<i64: 1, 64, 16>}, {pipeline_mode = #tpu.pipeline_mode<synchronous>, transform_indices = @transform_1, window_bounds = array<i64: 16, 512>}, {pipeline_mode = #tpu.pipeline_mode<synchronous>, transform_indices = @transform_2, window_bounds = array<i64: 128, 512>}, {pipeline_mode = #tpu.pipeline_mode<synchronous>, transform_indices = @transform_3, window_bounds = array<i64: 1, 512>}, {pipeline_mode = #tpu.pipeline_mode<synchronous>, transform_indices = @transform_4, window_bounds = array<i64: 128, 640>}, {pipeline_mode = #tpu.pipeline_mode<synchronous>, transform_indices = @transform_5, window_bounds = array<i64: 1, 640>}, {transform_indices = @transform_6, window_bounds = array<i64: 8, 640>}]} {
    %c0_i32 = arith.constant 0 : i32
    %0 = arith.cmpi eq, %arg1, %c0_i32 : i32
    %1 = arith.extui %0 : i1 to i32
    %c0_i32_0 = arith.constant 0 : i32
    %2 = arith.cmpi ne, %1, %c0_i32_0 : i32
    scf.if %2 {
      %cst_54 = arith.constant 0.000000e+00 : f32
      %195 = vector.broadcast %cst_54 : f32 to vector<8x128xf32>
      %c0_55 = arith.constant 0 : index
      %c0_56 = arith.constant 0 : index
      %196 = vector.load %arg10[%c0_55, %c0_56] : memref<8x128xf32, #tpu.memory_space<vmem>>, vector<8x128xf32>
      tpu.vector_store %arg10[%c0_55, %c0_56], %195 {strides = array<i32>} : memref<8x128xf32, #tpu.memory_space<vmem>>, vector<8x128xf32>,
      %cst_57 = arith.constant 0.000000e+00 : f32
      %197 = vector.broadcast %cst_57 : f32 to vector<8x128xf32>
      %c0_58 = arith.constant 0 : index
      %c0_59 = arith.constant 0 : index
      %198 = vector.load %arg11[%c0_58, %c0_59] : memref<8x128xf32, #tpu.memory_space<vmem>>, vector<8x128xf32>
      tpu.vector_store %arg11[%c0_58, %c0_59], %197 {strides = array<i32>} : memref<8x128xf32, #tpu.memory_space<vmem>>, vector<8x128xf32>,
    } else {
    }
    %c0 = arith.constant 0 : index
    %c0_1 = arith.constant 0 : index
    %c0_2 = arith.constant 0 : index
    %3 = vector.load %arg2[%c0, %c0_1, %c0_2] : memref<1x64x16xf32, #tpu.memory_space<vmem>>, vector<1x64x16xf32>
    %4 = vector.shape_cast %3 : vector<1x64x16xf32> to vector<64x16xf32>
    %c0_3 = arith.constant 0 : index
    %c0_4 = arith.constant 0 : index
    %5 = vector.load %arg3[%c0_3, %c0_4] : memref<16x512xf32, #tpu.memory_space<vmem>>, vector<16x512xf32>
    %cst = arith.constant dense<0.000000e+00> : vector<64x512xf32>
    %6 = tpu.matmul %4, %5, %cst {dimension_numbers = #tpu.dot_dimension_numbers<[1], [0], [0], [1], [0, 0, 1, 1], [], []>} : vector<64x16xf32>, vector<16x512xf32>, vector<64x512xf32> -> vector<64x512xf32>
    %c0_5 = arith.constant 0 : index
    %c0_6 = arith.constant 0 : index
    %7 = vector.load %arg5[%c0_5, %c0_6] : memref<1x512xf32, #tpu.memory_space<vmem>>, vector<1x512xf32>
    %8 = vector.broadcast %7 : vector<1x512xf32> to vector<64x512xf32>
    %9 = arith.addf %6, %8 : vector<64x512xf32>
    %c0_7 = arith.constant 0 : index
    %c0_8 = arith.constant 0 : index
    %10 = vector.load %arg9[%c0_7, %c0_8] : memref<64x512xf32, #tpu.memory_space<vmem>>, vector<64x512xf32>
    tpu.vector_store %arg9[%c0_7, %c0_8], %9 {strides = array<i32>} : memref<64x512xf32, #tpu.memory_space<vmem>>, vector<64x512xf32>,
    %c0_9 = arith.constant 0 : index
    %c0_10 = arith.constant 0 : index
    %11 = vector.load %arg4[%c0_9, %c0_10] : memref<128x512xf32, #tpu.memory_space<vmem>>, vector<128x512xf32>
    %c0_11 = arith.constant 0 : index
    %c0_12 = arith.constant 0 : index
    %12 = vector.load %arg10[%c0_11, %c0_12] : memref<8x128xf32, #tpu.memory_space<vmem>>, vector<8x128xf32>
    %c0_13 = arith.constant 0 : index
    %c0_14 = arith.constant 0 : index
    %13 = vector.load %arg11[%c0_13, %c0_14] : memref<8x128xf32, #tpu.memory_space<vmem>>, vector<8x128xf32>
    %c0_i32_15 = arith.constant 0 : i32
    %c8_i32 = arith.constant 8 : i32
    %14 = arith.muli %c0_i32_15, %c8_i32 : i32
    %15 = tpu.assume_multiple %14, 8 : i32
    %16 = arith.index_cast %15 : i32 to index
    %c0_16 = arith.constant 0 : index
    %17 = vector.load %arg9[%16, %c0_16] : memref<64x512xf32, #tpu.memory_space<vmem>>, vector<8x512xf32>
    %cst_17 = arith.constant dense<0.000000e+00> : vector<8x512xf32>
    %18 = tpu.matmul %12, %11, %cst_17 {dimension_numbers = #tpu.dot_dimension_numbers<[1], [0], [0], [1], [0, 0, 1, 1], [], []>} : vector<8x128xf32>, vector<128x512xf32>, vector<8x512xf32> -> vector<8x512xf32>
    %19 = arith.addf %17, %18 : vector<8x512xf32>
    %20 = vector.extract_strided_slice %19 {offsets = [0, 0], sizes = [8, 384], strides = [1, 1]} : vector<8x512xf32> to vector<8x384xf32>
    %21 = arith.negf %20 : vector<8x384xf32>
    %22 = math.exp %21 : vector<8x384xf32>
    %cst_18 = arith.constant 1.000000e+00 : f32
    %23 = vector.broadcast %cst_18 : f32 to vector<8x384xf32>
    %24 = arith.addf %23, %22 : vector<8x384xf32>
    %25 = arith.divf %23, %24 : vector<8x384xf32>
    %26 = vector.extract_strided_slice %19 {offsets = [0, 384], sizes = [8, 128], strides = [1, 1]} : vector<8x512xf32> to vector<8x128xf32>
    %27 = math.tanh %26 : vector<8x128xf32>
    %28 = vector.extract_strided_slice %25 {offsets = [0, 0], sizes = [8, 128], strides = [1, 1]} : vector<8x384xf32> to vector<8x128xf32>
    %29 = vector.extract_strided_slice %25 {offsets = [0, 128], sizes = [8, 128], strides = [1, 1]} : vector<8x384xf32> to vector<8x128xf32>
    %30 = vector.extract_strided_slice %25 {offsets = [0, 256], sizes = [8, 128], strides = [1, 1]} : vector<8x384xf32> to vector<8x128xf32>
    %31 = arith.mulf %29, %13 : vector<8x128xf32>
    %32 = arith.mulf %28, %27 : vector<8x128xf32>
    %33 = arith.addf %31, %32 : vector<8x128xf32>
    %34 = math.tanh %33 : vector<8x128xf32>
    %35 = arith.mulf %30, %34 : vector<8x128xf32>
    %c1_i32 = arith.constant 1 : i32
    %c8_i32_19 = arith.constant 8 : i32
    %36 = arith.muli %c1_i32, %c8_i32_19 : i32
    %37 = tpu.assume_multiple %36, 8 : i32
    %38 = arith.index_cast %37 : i32 to index
    %c0_20 = arith.constant 0 : index
    %39 = vector.load %arg9[%38, %c0_20] : memref<64x512xf32, #tpu.memory_space<vmem>>, vector<8x512xf32>
    %cst_21 = arith.constant dense<0.000000e+00> : vector<8x512xf32>
    %40 = tpu.matmul %35, %11, %cst_21 {dimension_numbers = #tpu.dot_dimension_numbers<[1], [0], [0], [1], [0, 0, 1, 1], [], []>} : vector<8x128xf32>, vector<128x512xf32>, vector<8x512xf32> -> vector<8x512xf32>
    %41 = arith.addf %39, %40 : vector<8x512xf32>
    %42 = vector.extract_strided_slice %41 {offsets = [0, 0], sizes = [8, 384], strides = [1, 1]} : vector<8x512xf32> to vector<8x384xf32>
    %43 = arith.negf %42 : vector<8x384xf32>
    %44 = math.exp %43 : vector<8x384xf32>
    %cst_22 = arith.constant 1.000000e+00 : f32
    %45 = vector.broadcast %cst_22 : f32 to vector<8x384xf32>
    %46 = arith.addf %45, %44 : vector<8x384xf32>
    %47 = arith.divf %45, %46 : vector<8x384xf32>
    %48 = vector.extract_strided_slice %41 {offsets = [0, 384], sizes = [8, 128], strides = [1, 1]} : vector<8x512xf32> to vector<8x128xf32>
    %49 = math.tanh %48 : vector<8x128xf32>
    %50 = vector.extract_strided_slice %47 {offsets = [0, 0], sizes = [8, 128], strides = [1, 1]} : vector<8x384xf32> to vector<8x128xf32>
    %51 = vector.extract_strided_slice %47 {offsets = [0, 128], sizes = [8, 128], strides = [1, 1]} : vector<8x384xf32> to vector<8x128xf32>
    %52 = vector.extract_strided_slice %47 {offsets = [0, 256], sizes = [8, 128], strides = [1, 1]} : vector<8x384xf32> to vector<8x128xf32>
    %53 = arith.mulf %51, %33 : vector<8x128xf32>
    %54 = arith.mulf %50, %49 : vector<8x128xf32>
    %55 = arith.addf %53, %54 : vector<8x128xf32>
    %56 = math.tanh %55 : vector<8x128xf32>
    %57 = arith.mulf %52, %56 : vector<8x128xf32>
    %c2_i32 = arith.constant 2 : i32
    %c8_i32_23 = arith.constant 8 : i32
    %58 = arith.muli %c2_i32, %c8_i32_23 : i32
    %59 = tpu.assume_multiple %58, 8 : i32
    %60 = arith.index_cast %59 : i32 to index
    %c0_24 = arith.constant 0 : index
    %61 = vector.load %arg9[%60, %c0_24] : memref<64x512xf32, #tpu.memory_space<vmem>>, vector<8x512xf32>
    %cst_25 = arith.constant dense<0.000000e+00> : vector<8x512xf32>
    %62 = tpu.matmul %57, %11, %cst_25 {dimension_numbers = #tpu.dot_dimension_numbers<[1], [0], [0], [1], [0, 0, 1, 1], [], []>} : vector<8x128xf32>, vector<128x512xf32>, vector<8x512xf32> -> vector<8x512xf32>
    %63 = arith.addf %61, %62 : vector<8x512xf32>
    %64 = vector.extract_strided_slice %63 {offsets = [0, 0], sizes = [8, 384], strides = [1, 1]} : vector<8x512xf32> to vector<8x384xf32>
    %65 = arith.negf %64 : vector<8x384xf32>
    %66 = math.exp %65 : vector<8x384xf32>
    %cst_26 = arith.constant 1.000000e+00 : f32
    %67 = vector.broadcast %cst_26 : f32 to vector<8x384xf32>
    %68 = arith.addf %67, %66 : vector<8x384xf32>
    %69 = arith.divf %67, %68 : vector<8x384xf32>
    %70 = vector.extract_strided_slice %63 {offsets = [0, 384], sizes = [8, 128], strides = [1, 1]} : vector<8x512xf32> to vector<8x128xf32>
    %71 = math.tanh %70 : vector<8x128xf32>
    %72 = vector.extract_strided_slice %69 {offsets = [0, 0], sizes = [8, 128], strides = [1, 1]} : vector<8x384xf32> to vector<8x128xf32>
    %73 = vector.extract_strided_slice %69 {offsets = [0, 128], sizes = [8, 128], strides = [1, 1]} : vector<8x384xf32> to vector<8x128xf32>
    %74 = vector.extract_strided_slice %69 {offsets = [0, 256], sizes = [8, 128], strides = [1, 1]} : vector<8x384xf32> to vector<8x128xf32>
    %75 = arith.mulf %73, %55 : vector<8x128xf32>
    %76 = arith.mulf %72, %71 : vector<8x128xf32>
    %77 = arith.addf %75, %76 : vector<8x128xf32>
    %78 = math.tanh %77 : vector<8x128xf32>
    %79 = arith.mulf %74, %78 : vector<8x128xf32>
    %c3_i32 = arith.constant 3 : i32
    %c8_i32_27 = arith.constant 8 : i32
    %80 = arith.muli %c3_i32, %c8_i32_27 : i32
    %81 = tpu.assume_multiple %80, 8 : i32
    %82 = arith.index_cast %81 : i32 to index
    %c0_28 = arith.constant 0 : index
    %83 = vector.load %arg9[%82, %c0_28] : memref<64x512xf32, #tpu.memory_space<vmem>>, vector<8x512xf32>
    %cst_29 = arith.constant dense<0.000000e+00> : vector<8x512xf32>
    %84 = tpu.matmul %79, %11, %cst_29 {dimension_numbers = #tpu.dot_dimension_numbers<[1], [0], [0], [1], [0, 0, 1, 1], [], []>} : vector<8x128xf32>, vector<128x512xf32>, vector<8x512xf32> -> vector<8x512xf32>
    %85 = arith.addf %83, %84 : vector<8x512xf32>
    %86 = vector.extract_strided_slice %85 {offsets = [0, 0], sizes = [8, 384], strides = [1, 1]} : vector<8x512xf32> to vector<8x384xf32>
    %87 = arith.negf %86 : vector<8x384xf32>
    %88 = math.exp %87 : vector<8x384xf32>
    %cst_30 = arith.constant 1.000000e+00 : f32
    %89 = vector.broadcast %cst_30 : f32 to vector<8x384xf32>
    %90 = arith.addf %89, %88 : vector<8x384xf32>
    %91 = arith.divf %89, %90 : vector<8x384xf32>
    %92 = vector.extract_strided_slice %85 {offsets = [0, 384], sizes = [8, 128], strides = [1, 1]} : vector<8x512xf32> to vector<8x128xf32>
    %93 = math.tanh %92 : vector<8x128xf32>
    %94 = vector.extract_strided_slice %91 {offsets = [0, 0], sizes = [8, 128], strides = [1, 1]} : vector<8x384xf32> to vector<8x128xf32>
    %95 = vector.extract_strided_slice %91 {offsets = [0, 128], sizes = [8, 128], strides = [1, 1]} : vector<8x384xf32> to vector<8x128xf32>
    %96 = vector.extract_strided_slice %91 {offsets = [0, 256], sizes = [8, 128], strides = [1, 1]} : vector<8x384xf32> to vector<8x128xf32>
    %97 = arith.mulf %95, %77 : vector<8x128xf32>
    %98 = arith.mulf %94, %93 : vector<8x128xf32>
    %99 = arith.addf %97, %98 : vector<8x128xf32>
    %100 = math.tanh %99 : vector<8x128xf32>
    %101 = arith.mulf %96, %100 : vector<8x128xf32>
    %c4_i32 = arith.constant 4 : i32
    %c8_i32_31 = arith.constant 8 : i32
    %102 = arith.muli %c4_i32, %c8_i32_31 : i32
    %103 = tpu.assume_multiple %102, 8 : i32
    %104 = arith.index_cast %103 : i32 to index
    %c0_32 = arith.constant 0 : index
    %105 = vector.load %arg9[%104, %c0_32] : memref<64x512xf32, #tpu.memory_space<vmem>>, vector<8x512xf32>
    %cst_33 = arith.constant dense<0.000000e+00> : vector<8x512xf32>
    %106 = tpu.matmul %101, %11, %cst_33 {dimension_numbers = #tpu.dot_dimension_numbers<[1], [0], [0], [1], [0, 0, 1, 1], [], []>} : vector<8x128xf32>, vector<128x512xf32>, vector<8x512xf32> -> vector<8x512xf32>
    %107 = arith.addf %105, %106 : vector<8x512xf32>
    %108 = vector.extract_strided_slice %107 {offsets = [0, 0], sizes = [8, 384], strides = [1, 1]} : vector<8x512xf32> to vector<8x384xf32>
    %109 = arith.negf %108 : vector<8x384xf32>
    %110 = math.exp %109 : vector<8x384xf32>
    %cst_34 = arith.constant 1.000000e+00 : f32
    %111 = vector.broadcast %cst_34 : f32 to vector<8x384xf32>
    %112 = arith.addf %111, %110 : vector<8x384xf32>
    %113 = arith.divf %111, %112 : vector<8x384xf32>
    %114 = vector.extract_strided_slice %107 {offsets = [0, 384], sizes = [8, 128], strides = [1, 1]} : vector<8x512xf32> to vector<8x128xf32>
    %115 = math.tanh %114 : vector<8x128xf32>
    %116 = vector.extract_strided_slice %113 {offsets = [0, 0], sizes = [8, 128], strides = [1, 1]} : vector<8x384xf32> to vector<8x128xf32>
    %117 = vector.extract_strided_slice %113 {offsets = [0, 128], sizes = [8, 128], strides = [1, 1]} : vector<8x384xf32> to vector<8x128xf32>
    %118 = vector.extract_strided_slice %113 {offsets = [0, 256], sizes = [8, 128], strides = [1, 1]} : vector<8x384xf32> to vector<8x128xf32>
    %119 = arith.mulf %117, %99 : vector<8x128xf32>
    %120 = arith.mulf %116, %115 : vector<8x128xf32>
    %121 = arith.addf %119, %120 : vector<8x128xf32>
    %122 = math.tanh %121 : vector<8x128xf32>
    %123 = arith.mulf %118, %122 : vector<8x128xf32>
    %c5_i32 = arith.constant 5 : i32
    %c8_i32_35 = arith.constant 8 : i32
    %124 = arith.muli %c5_i32, %c8_i32_35 : i32
    %125 = tpu.assume_multiple %124, 8 : i32
    %126 = arith.index_cast %125 : i32 to index
    %c0_36 = arith.constant 0 : index
    %127 = vector.load %arg9[%126, %c0_36] : memref<64x512xf32, #tpu.memory_space<vmem>>, vector<8x512xf32>
    %cst_37 = arith.constant dense<0.000000e+00> : vector<8x512xf32>
    %128 = tpu.matmul %123, %11, %cst_37 {dimension_numbers = #tpu.dot_dimension_numbers<[1], [0], [0], [1], [0, 0, 1, 1], [], []>} : vector<8x128xf32>, vector<128x512xf32>, vector<8x512xf32> -> vector<8x512xf32>
    %129 = arith.addf %127, %128 : vector<8x512xf32>
    %130 = vector.extract_strided_slice %129 {offsets = [0, 0], sizes = [8, 384], strides = [1, 1]} : vector<8x512xf32> to vector<8x384xf32>
    %131 = arith.negf %130 : vector<8x384xf32>
    %132 = math.exp %131 : vector<8x384xf32>
    %cst_38 = arith.constant 1.000000e+00 : f32
    %133 = vector.broadcast %cst_38 : f32 to vector<8x384xf32>
    %134 = arith.addf %133, %132 : vector<8x384xf32>
    %135 = arith.divf %133, %134 : vector<8x384xf32>
    %136 = vector.extract_strided_slice %129 {offsets = [0, 384], sizes = [8, 128], strides = [1, 1]} : vector<8x512xf32> to vector<8x128xf32>
    %137 = math.tanh %136 : vector<8x128xf32>
    %138 = vector.extract_strided_slice %135 {offsets = [0, 0], sizes = [8, 128], strides = [1, 1]} : vector<8x384xf32> to vector<8x128xf32>
    %139 = vector.extract_strided_slice %135 {offsets = [0, 128], sizes = [8, 128], strides = [1, 1]} : vector<8x384xf32> to vector<8x128xf32>
    %140 = vector.extract_strided_slice %135 {offsets = [0, 256], sizes = [8, 128], strides = [1, 1]} : vector<8x384xf32> to vector<8x128xf32>
    %141 = arith.mulf %139, %121 : vector<8x128xf32>
    %142 = arith.mulf %138, %137 : vector<8x128xf32>
    %143 = arith.addf %141, %142 : vector<8x128xf32>
    %144 = math.tanh %143 : vector<8x128xf32>
    %145 = arith.mulf %140, %144 : vector<8x128xf32>
    %c6_i32 = arith.constant 6 : i32
    %c8_i32_39 = arith.constant 8 : i32
    %146 = arith.muli %c6_i32, %c8_i32_39 : i32
    %147 = tpu.assume_multiple %146, 8 : i32
    %148 = arith.index_cast %147 : i32 to index
    %c0_40 = arith.constant 0 : index
    %149 = vector.load %arg9[%148, %c0_40] : memref<64x512xf32, #tpu.memory_space<vmem>>, vector<8x512xf32>
    %cst_41 = arith.constant dense<0.000000e+00> : vector<8x512xf32>
    %150 = tpu.matmul %145, %11, %cst_41 {dimension_numbers = #tpu.dot_dimension_numbers<[1], [0], [0], [1], [0, 0, 1, 1], [], []>} : vector<8x128xf32>, vector<128x512xf32>, vector<8x512xf32> -> vector<8x512xf32>
    %151 = arith.addf %149, %150 : vector<8x512xf32>
    %152 = vector.extract_strided_slice %151 {offsets = [0, 0], sizes = [8, 384], strides = [1, 1]} : vector<8x512xf32> to vector<8x384xf32>
    %153 = arith.negf %152 : vector<8x384xf32>
    %154 = math.exp %153 : vector<8x384xf32>
    %cst_42 = arith.constant 1.000000e+00 : f32
    %155 = vector.broadcast %cst_42 : f32 to vector<8x384xf32>
    %156 = arith.addf %155, %154 : vector<8x384xf32>
    %157 = arith.divf %155, %156 : vector<8x384xf32>
    %158 = vector.extract_strided_slice %151 {offsets = [0, 384], sizes = [8, 128], strides = [1, 1]} : vector<8x512xf32> to vector<8x128xf32>
    %159 = math.tanh %158 : vector<8x128xf32>
    %160 = vector.extract_strided_slice %157 {offsets = [0, 0], sizes = [8, 128], strides = [1, 1]} : vector<8x384xf32> to vector<8x128xf32>
    %161 = vector.extract_strided_slice %157 {offsets = [0, 128], sizes = [8, 128], strides = [1, 1]} : vector<8x384xf32> to vector<8x128xf32>
    %162 = vector.extract_strided_slice %157 {offsets = [0, 256], sizes = [8, 128], strides = [1, 1]} : vector<8x384xf32> to vector<8x128xf32>
    %163 = arith.mulf %161, %143 : vector<8x128xf32>
    %164 = arith.mulf %160, %159 : vector<8x128xf32>
    %165 = arith.addf %163, %164 : vector<8x128xf32>
    %166 = math.tanh %165 : vector<8x128xf32>
    %167 = arith.mulf %162, %166 : vector<8x128xf32>
    %c7_i32 = arith.constant 7 : i32
    %c8_i32_43 = arith.constant 8 : i32
    %168 = arith.muli %c7_i32, %c8_i32_43 : i32
    %169 = tpu.assume_multiple %168, 8 : i32
    %170 = arith.index_cast %169 : i32 to index
    %c0_44 = arith.constant 0 : index
    %171 = vector.load %arg9[%170, %c0_44] : memref<64x512xf32, #tpu.memory_space<vmem>>, vector<8x512xf32>
    %cst_45 = arith.constant dense<0.000000e+00> : vector<8x512xf32>
    %172 = tpu.matmul %167, %11, %cst_45 {dimension_numbers = #tpu.dot_dimension_numbers<[1], [0], [0], [1], [0, 0, 1, 1], [], []>} : vector<8x128xf32>, vector<128x512xf32>, vector<8x512xf32> -> vector<8x512xf32>
    %173 = arith.addf %171, %172 : vector<8x512xf32>
    %174 = vector.extract_strided_slice %173 {offsets = [0, 0], sizes = [8, 384], strides = [1, 1]} : vector<8x512xf32> to vector<8x384xf32>
    %175 = arith.negf %174 : vector<8x384xf32>
    %176 = math.exp %175 : vector<8x384xf32>
    %cst_46 = arith.constant 1.000000e+00 : f32
    %177 = vector.broadcast %cst_46 : f32 to vector<8x384xf32>
    %178 = arith.addf %177, %176 : vector<8x384xf32>
    %179 = arith.divf %177, %178 : vector<8x384xf32>
    %180 = vector.extract_strided_slice %173 {offsets = [0, 384], sizes = [8, 128], strides = [1, 1]} : vector<8x512xf32> to vector<8x128xf32>
    %181 = math.tanh %180 : vector<8x128xf32>
    %182 = vector.extract_strided_slice %179 {offsets = [0, 0], sizes = [8, 128], strides = [1, 1]} : vector<8x384xf32> to vector<8x128xf32>
    %183 = vector.extract_strided_slice %179 {offsets = [0, 128], sizes = [8, 128], strides = [1, 1]} : vector<8x384xf32> to vector<8x128xf32>
    %184 = vector.extract_strided_slice %179 {offsets = [0, 256], sizes = [8, 128], strides = [1, 1]} : vector<8x384xf32> to vector<8x128xf32>
    %185 = arith.mulf %183, %165 : vector<8x128xf32>
    %186 = arith.mulf %182, %181 : vector<8x128xf32>
    %187 = arith.addf %185, %186 : vector<8x128xf32>
    %188 = math.tanh %187 : vector<8x128xf32>
    %189 = arith.mulf %184, %188 : vector<8x128xf32>
    %c8_i32_47 = arith.constant 8 : i32
    %c0_48 = arith.constant 0 : index
    %c0_49 = arith.constant 0 : index
    %190 = vector.load %arg10[%c0_48, %c0_49] : memref<8x128xf32, #tpu.memory_space<vmem>>, vector<8x128xf32>
    tpu.vector_store %arg10[%c0_48, %c0_49], %189 {strides = array<i32>} : memref<8x128xf32, #tpu.memory_space<vmem>>, vector<8x128xf32>,
    %c0_50 = arith.constant 0 : index
    %c0_51 = arith.constant 0 : index
    %191 = vector.load %arg11[%c0_50, %c0_51] : memref<8x128xf32, #tpu.memory_space<vmem>>, vector<8x128xf32>
    tpu.vector_store %arg11[%c0_50, %c0_51], %187 {strides = array<i32>} : memref<8x128xf32, #tpu.memory_space<vmem>>, vector<8x128xf32>,
    %c0_i32_52 = arith.constant 0 : i32
    %192 = arith.cmpi eq, %arg1, %c0_i32_52 : i32
    %193 = arith.extui %192 : i1 to i32
    %c0_i32_53 = arith.constant 0 : i32
    %194 = arith.cmpi ne, %193, %c0_i32_53 : i32
    scf.if %194 {
      %c0_54 = arith.constant 0 : index
      %c0_55 = arith.constant 0 : index
      %195 = vector.load %arg10[%c0_54, %c0_55] : memref<8x128xf32, #tpu.memory_space<vmem>>, vector<8x128xf32>
      %cst_56 = arith.constant 0.000000e+00 : f32
      %196 = vector.broadcast %cst_56 : f32 to vector<8x128xf32>
      %197 = arith.maximumf %195, %196 : vector<8x128xf32>
      %c0_57 = arith.constant 0 : index
      %c0_58 = arith.constant 0 : index
      %198 = vector.load %arg6[%c0_57, %c0_58] : memref<128x640xf32, #tpu.memory_space<vmem>>, vector<128x640xf32>
      %cst_59 = arith.constant dense<0.000000e+00> : vector<8x640xf32>
      %199 = tpu.matmul %197, %198, %cst_59 {dimension_numbers = #tpu.dot_dimension_numbers<[1], [0], [0], [1], [0, 0, 1, 1], [], []>} : vector<8x128xf32>, vector<128x640xf32>, vector<8x640xf32> -> vector<8x640xf32>
      %c0_60 = arith.constant 0 : index
      %c0_61 = arith.constant 0 : index
      %200 = vector.load %arg7[%c0_60, %c0_61] : memref<1x640xf32, #tpu.memory_space<vmem>>, vector<1x640xf32>
      %201 = vector.broadcast %200 : vector<1x640xf32> to vector<8x640xf32>
      %202 = arith.addf %199, %201 : vector<8x640xf32>
      %c0_62 = arith.constant 0 : index
      %c0_63 = arith.constant 0 : index
      %203 = vector.load %arg8[%c0_62, %c0_63] : memref<8x640xf32, #tpu.memory_space<vmem>>, vector<8x640xf32>
      tpu.vector_store %arg8[%c0_62, %c0_63], %202 {strides = array<i32>} : memref<8x640xf32, #tpu.memory_space<vmem>>, vector<8x640xf32>,
    } else {
    }
    return
  }
  func.func @transform_0(%arg0: i32, %arg1: i32) -> (i32, i32, i32) {
    %c0_i32 = arith.constant 0 : i32
    %c0_i32_0 = arith.constant 0 : i32
    return %arg0, %arg1, %c0_i32 : i32, i32, i32
  }
  func.func @transform_1(%arg0: i32, %arg1: i32) -> (i32, i32) {
    %c0_i32 = arith.constant 0 : i32
    %c0_i32_0 = arith.constant 0 : i32
    %c0_i32_1 = arith.constant 0 : i32
    return %c0_i32, %c0_i32_0 : i32, i32
  }
  func.func @transform_2(%arg0: i32, %arg1: i32) -> (i32, i32) {
    %c0_i32 = arith.constant 0 : i32
    %c0_i32_0 = arith.constant 0 : i32
    %c0_i32_1 = arith.constant 0 : i32
    return %c0_i32, %c0_i32_0 : i32, i32
  }
  func.func @transform_3(%arg0: i32, %arg1: i32) -> (i32, i32) {
    %c0_i32 = arith.constant 0 : i32
    %c0_i32_0 = arith.constant 0 : i32
    %c0_i32_1 = arith.constant 0 : i32
    return %c0_i32, %c0_i32_0 : i32, i32
  }
  func.func @transform_4(%arg0: i32, %arg1: i32) -> (i32, i32) {
    %c0_i32 = arith.constant 0 : i32
    %c0_i32_0 = arith.constant 0 : i32
    %c0_i32_1 = arith.constant 0 : i32
    return %c0_i32, %c0_i32_0 : i32, i32
  }
  func.func @transform_5(%arg0: i32, %arg1: i32) -> (i32, i32) {
    %c0_i32 = arith.constant 0 : i32
    %c0_i32_0 = arith.constant 0 : i32
    %c0_i32_1 = arith.constant 0 : i32
    return %c0_i32, %c0_i32_0 : i32, i32
  }
  func.func @transform_6(%arg0: i32, %arg1: i32) -> (i32, i32) {
    %c0_i32 = arith.constant 0 : i32
    %c0_i32_0 = arith.constant 0 : i32
    return %arg0, %c0_i32 : i32, i32
  }
}

</mosaic_0001>

<bundles_post_ra>
// kernel: tpu_custom_call.1
= control target key start
LH: loop header
LB: loop body
LE: loop exit
PB: predicated region body
PF: predicated region fallthrough
CT: control target
= control target key end

     0   :  { %11 = vsyncpa [#allocation6], 0  ;;  %s3796_s0 = inlined_call_operand.vmem [shape: f32[1,64,16], index: 0, kind: input, shape index: {}]   ;;  %s3797_s1 = inlined_call_operand.vmem [shape: f32[16,512], index: 1, kind: input, shape index: {}]   ;;  %s3798_s2 = inlined_call_operand.hbm [shape: f32[128,512], index: 2, kind: input, shape index: {}]   ;;  %s3799_s3 = inlined_call_operand.vmem [shape: f32[1,512], index: 3, kind: input, shape index: {}]   ;;  %s3800_s4 = inlined_call_operand.hbm [shape: f32[128,640], index: 4, kind: input, shape index: {}]   ;;  %s3801_s5 = inlined_call_operand.vmem [shape: f32[1,640], index: 5, kind: input, shape index: {}]   ;;  %s3802_s6 = inlined_call_operand.hbm [shape: f32[8,640], index: 6, kind: output, shape index: {}]  }
   0x1   :  { %12 = vsyncpa [#allocation9], 0 }
   0x2   :  { %13 = vsyncpa [#allocation7], 0  ;;  %s3189_s21 = smov [#allocation5]   ;;  %s3117_s25 = scalar_lea.hbm %s3798_s2, 8192 }
   0x3   :  { %s23_s22 = sshll.u32 %s3189_s21, 4  ;;  %p3118_p0 = scmp.ne.s32.totalorder %s3798_s2, %s3117_s25  ;;  %s24_s22 = int_to_ptr.vmem [resolvable:$true] %s23_s22 }
   0x4   :  { %p3121_p1 = scmp.lt.u32.totalorder %s3117_s25, %s3798_s2 }
   0x6   :  { %p3123_p2 = pnand %p3121_p1, %p3118_p0 }
   0x8   :  { %3126 = shalt.err (!%p3123_p2)
}
   0x9   :  { %s3127_s30 = scalar_lea.vmem %s24_s22, 8192  ;;  %p3132_p4 = scmp.lt.s32.totalorder %s24_s22, %s24_s22 }
   0xa   :  { %p3128_p3 = scmp.ne.s32.totalorder %s24_s22, %s3127_s30  ;;  %p3133_p5 = scmp.lt.s32.totalorder %s3127_s30, %s3127_s30 }
   0xc   :  { %p3134_p6 = por %p3133_p5, %p3132_p4 }
   0xe   :  { %p3135_p7 = pnand %p3134_p6, %p3128_p3 }
  0x10   :  { %3138 = shalt.err (!%p3135_p7)
}
  0x11   :  { %s3190_s7 = smov 512   ;;  %s3191_s8 = smov 32  }
  0x12   :  { %29 = dma.hbm_to_vmem [thread:$0]  %s3798_s2, 8192, %s24_s22, [#allocation6], %s3190_s7, %s3190_s7, %s3191_s8  }
  0x13   :  { %s3192_s11 = smov [#allocation8]   ;;  %s3139_s15 = scalar_lea.hbm %s3800_s4, 10240 }
  0x14   :  { %s37_s12 = sshll.u32 %s3192_s11, 4  ;;  %p3140_p8 = scmp.ne.s32.totalorder %s3800_s4, %s3139_s15  ;;  %s38_s12 = int_to_ptr.vmem [resolvable:$true] %s37_s12 }
  0x15   :  { %p3143_p9 = scmp.lt.u32.totalorder %s3139_s15, %s3800_s4 }
  0x17   :  { %p3145_p10 = pnand %p3143_p9, %p3140_p8 }
  0x19   :  { %3148 = shalt.err (!%p3145_p10)
}
  0x1a   :  { %s3149_s20 = scalar_lea.vmem %s38_s12, 10240  ;;  %p3154_p12 = scmp.lt.s32.totalorder %s38_s12, %s38_s12 }
  0x1b   :  { %p3150_p11 = scmp.ne.s32.totalorder %s38_s12, %s3149_s20  ;;  %p3155_p13 = scmp.lt.s32.totalorder %s3149_s20, %s3149_s20 }
  0x1d   :  { %p3156_p0 = por %p3155_p13, %p3154_p12 }
  0x1f   :  { %p3157_p1 = pnand %p3156_p0, %p3150_p11 }
  0x21   :  { %3160 = shalt.err (!%p3157_p1)
}
  0x22   :  { %s3193_s2 = smov 640   ;;  %s3194_s21 = smov 40  }
  0x23   :  { %43 = dma.hbm_to_vmem [thread:$0]  %s3800_s4, 10240, %s38_s12, [#allocation9], %s3193_s2, %s3193_s2, %s3194_s21  }
  0x24   :  { %3183 = dma.done.wait [#allocation6], 8192  }
  0x25   :  { %3184 = vsyncadd [#allocation6], 4294959104 }
  0x26   :  { %3185 = dma.done.wait [#allocation9], 10240  }
  0x27   :  { %3186 = vsyncadd [#allocation9], 4294957056  ;;  %v3195_v0 = vmov 0.0   ;;  %v67_v1 = vld [vmem:[%s3797_s1 + $0x8] sm:$0xff]  ;;  %v69_v3 = vld [vmem:[%s3797_s1 + $0x18] sm:$0xff]  ;;  %vm96_vm0 = vcmask 130048  }
  0x28   :  { %185 = vmatprep.mubr.f32.mxu0 %v3195_v0  ;;  %298 = vmatprep.mubr.f32.mxu1 %v3195_v0  ;;  %v71_v2 = vld [vmem:[%s3797_s1 + $0x28] sm:$0xff]  ;;  %v73_v5 = vld [vmem:[%s3797_s1 + $0x38] sm:$0xff]  ;;  %v66_v6 = vld [vmem:[%s3797_s1] sm:$0xff]  ;;  %vm3197_vm1 = vmmov 0  }
  0x29   :  { %v2307_v4 = vpack.c.bf16 %v71_v2, %v67_v1  ;;  %v70_v7 = vld [vmem:[%s3797_s1 + $0x20] sm:$0xff]  ;;  %v2311_v8 = vpack.c.bf16 %v73_v5, %v69_v3  ;;  %v68_v10 = vld [vmem:[%s3797_s1 + $0x10] sm:$0xff]  ;;  %v380_v14 = vld [vmem:[#allocation5 + $0x8] sm:$0xff] }
  0x2a   :  { %v2309_v9 = vpack.c.bf16 %v70_v7, %v66_v6  ;;  %v72_v11 = vld [vmem:[%s3797_s1 + $0x30] sm:$0xff]  ;;  %v58_v12 = vld [vmem:[%s3796_s0] sm:$0xff]  ;;  %v384_v15 = vld [vmem:[#allocation5 + $0x28] sm:$0xff] }
  0x2b   :  { %2308 = vmatprep.subr.bf16.mxu0 %v2307_v4  ;;  %v2313_v13 = vpack.c.bf16 %v72_v11, %v68_v10  ;;  %v382_v16 = vld [vmem:[#allocation5 + $0x18] sm:$0xff]  ;;  %2312 = vmatprep.subr.bf16.mxu1 %v2311_v8  ;;  %v3287_v17 = vpack.c.bf16 %v384_v15, %v380_v14  ;;  %v379_v19 = vld [vmem:[#allocation5] sm:$0xff]  ;;  %v381_v23 = vld [vmem:[#allocation5 + $0x10] sm:$0xff] }
  0x2c   :  { %2310 = vmatpush1.bf16.msra.mxu0 %v2309_v9  ;;  %v386_v18 = vld [vmem:[#allocation5 + $0x38] sm:$0xff]  ;;  %v383_v20 = vld [vmem:[#allocation5 + $0x20] sm:$0xff]  ;;  %v385_v24 = vld [vmem:[#allocation5 + $0x30] sm:$0xff] }
  0x2d   :  { %2314 = vmatpush1.bf16.msra.mxu1 %v2313_v13  ;;  %v3289_v21 = vpack.c.bf16 %v386_v18, %v382_v16  ;;  %v3291_v22 = vpack.c.bf16 %v383_v20, %v379_v19  ;;  %2316 = vmatprep.subr.bf16.mxu0 %v3287_v17  ;;  %v3294_v25 = vpack.c.bf16 %v385_v24, %v381_v23  ;;  %v388_v26 = vld [vmem:[#allocation5 + $0x48] sm:$0xff]  ;;  %v390_v28 = vld [vmem:[#allocation5 + $0x58] sm:$0xff]  ;;  %v387_v31 = vld [vmem:[#allocation5 + $0x40] sm:$0xff] }
  0x2e   :  { %v392_v27 = vld [vmem:[#allocation5 + $0x68] sm:$0xff]  ;;  %v394_v30 = vld [vmem:[#allocation5 + $0x78] sm:$0xff]  ;;  %v391_v32 = vld [vmem:[#allocation5 + $0x60] sm:$0xff] }
  0x2f   :  { %2215 = vmatmul.mubr.msk.f32.vlgmr.msra.gmra.mrb[0].mxu0 %vm96_vm0, %v58_v12  ;;  %2348 = vmatprep.subr.bf16.mxu1 %v3289_v21  ;;  %v3298_v29 = vpack.c.bf16 %v392_v27, %v388_v26  ;;  %v59_v33 = vld [vmem:[%s3796_s0 + $0x8] sm:$0xff]  ;;  %v3305_v34 = vpack.c.bf16 %v394_v30, %v390_v28  ;;  %v3307_v35 = vpack.c.bf16 %v391_v32, %v387_v31  ;;  %v389_v36 = vld [vmem:[#allocation5 + $0x50] sm:$0xff]  ;;  %v398_v41 = vld [vmem:[#allocation5 + $0x98] sm:$0xff] }
  0x30   :  { %2223 = vmatmul.mubr.msk.f32.vlgmr.msra.gmra.mrb[0].mxu1 %vm96_vm0, %v58_v12  ;;  %2318 = vmatpush1.bf16.msra.mxu0 %v3291_v22  ;;  %v393_v37 = vld [vmem:[#allocation5 + $0x70] sm:$0xff]  ;;  %v396_v39 = vld [vmem:[#allocation5 + $0x88] sm:$0xff]  ;;  %v402_v43 = vld [vmem:[#allocation5 + $0xb8] sm:$0xff] }
  0x31   :  { %2350 = vmatpush1.bf16.msra.mxu1 %v3294_v25  ;;  %191 = vmatprep.mubr.f32.mxu0 %v3195_v0  ;;  %v3311_v38 = vpack.c.bf16 %v393_v37, %v389_v36  ;;  %v400_v40 = vld [vmem:[#allocation5 + $0xa8] sm:$0xff]  ;;  %v395_v44 = vld [vmem:[#allocation5 + $0x80] sm:$0xff]  ;;  %v60_v46 = vld [vmem:[%s3796_s0 + $0x10] sm:$0xff]  ;;  %v3322_v47 = vpack.c.bf16 %v402_v43, %v398_v41 }
  0x32   :  { %304 = vmatprep.mubr.f32.mxu1 %v3195_v0  ;;  %2320 = vmatprep.subr.bf16.mxu0 %v3298_v29  ;;  %v3315_v42 = vpack.c.bf16 %v400_v40, %v396_v39  ;;  %v399_v45 = vld [vmem:[#allocation5 + $0xa0] sm:$0xff]  ;;  %v397_v48 = vld [vmem:[#allocation5 + $0x90] sm:$0xff]  ;;  %v404_v51 = vld [vmem:[#allocation5 + $0xc8] sm:$0xff] }
  0x33   :  { %2216 = vmatmul.mubr.msk.f32.gmra.mrb[2].mxu0 %vm96_vm0, %v59_v33  ;;  %2352 = vmatprep.subr.bf16.mxu1 %v3305_v34  ;;  %v401_v49 = vld [vmem:[#allocation5 + $0xb0] sm:$0xff]  ;;  %v3326_v50 = vpack.c.bf16 %v399_v45, %v395_v44  ;;  %v408_v52 = vld [vmem:[#allocation5 + $0xe8] sm:$0xff]  ;;  %v406_v53 = vld [vmem:[#allocation5 + $0xd8] sm:$0xff] }
  0x34   :  { %2224 = vmatmul.mubr.msk.f32.gmra.mrb[2].mxu1 %vm96_vm0, %v59_v33  ;;  %2322 = vmatpush1.bf16.msra.mxu0 %v3307_v35  ;;  %v3330_v54 = vpack.c.bf16 %v401_v49, %v397_v48  ;;  %v410_v55 = vld [vmem:[#allocation5 + $0xf8] sm:$0xff]  ;;  %v403_v56 = vld [vmem:[#allocation5 + $0xc0] sm:$0xff]  ;;  %v3334_v58 = vpack.c.bf16 %v408_v52, %v404_v51  ;;  %v405_v59 = vld [vmem:[#allocation5 + $0xd0] sm:$0xff] }
  0x35   :  { %2354 = vmatpush1.bf16.msra.mxu1 %v3311_v38  ;;  %197 = vmatprep.mubr.f32.mxu0 %v3195_v0  ;;  %v407_v57 = vld [vmem:[#allocation5 + $0xe0] sm:$0xff]  ;;  %v409_v60 = vld [vmem:[#allocation5 + $0xf0] sm:$0xff]  ;;  %v3338_v61 = vpack.c.bf16 %v410_v55, %v406_v53  ;;  %v412_v62 = vld [vmem:[#allocation5 + $0x108] sm:$0xff] }
  0x36   :  { %310 = vmatprep.mubr.f32.mxu1 %v3195_v0  ;;  %2324 = vmatprep.subr.bf16.mxu0 %v3315_v42  ;;  %v416_v63 = vld [vmem:[#allocation5 + $0x128] sm:$0xff]  ;;  %v61_v1 = vld [vmem:[%s3796_s0 + $0x18] sm:$0xff]  ;;  %v3345_v2 = vpack.c.bf16 %v407_v57, %v403_v56  ;;  %v3349_v5 = vpack.c.bf16 %v409_v60, %v405_v59  ;;  %v411_v6 = vld [vmem:[#allocation5 + $0x100] sm:$0xff] }
  0x37   :  { %2217 = vmatmul.mubr.msk.f32.gmra.mrb[4].mxu0 %vm96_vm0, %v60_v46  ;;  %2356 = vmatprep.subr.bf16.mxu1 %v3322_v47  ;;  %v414_v3 = vld [vmem:[#allocation5 + $0x118] sm:$0xff]  ;;  %v415_v7 = vld [vmem:[#allocation5 + $0x120] sm:$0xff]  ;;  %v3353_v8 = vpack.c.bf16 %v416_v63, %v412_v62  ;;  %v413_v9 = vld [vmem:[#allocation5 + $0x110] sm:$0xff] }
  0x38   :  { %2225 = vmatmul.mubr.msk.f32.gmra.mrb[4].mxu1 %vm96_vm0, %v60_v46  ;;  %2326 = vmatpush1.bf16.msra.mxu0 %v3326_v50  ;;  %v418_v4 = vld [vmem:[#allocation5 + $0x138] sm:$0xff]  ;;  %v417_v10 = vld [vmem:[#allocation5 + $0x130] sm:$0xff]  ;;  %v420_v12 = vld [vmem:[#allocation5 + $0x148] sm:$0xff]  ;;  %v3364_v15 = vpack.c.bf16 %v415_v7, %v411_v6  ;;  %v76_v7 = vlaneseq }
  0x39   :  { %2358 = vmatpush1.bf16.msra.mxu1 %v3330_v54  ;;  %203 = vmatprep.mubr.f32.mxu0 %v3195_v0  ;;  %v3357_v11 = vpack.c.bf16 %v418_v4, %v414_v3  ;;  %v424_v13 = vld [vmem:[#allocation5 + $0x168] sm:$0xff]  ;;  %v62_v14 = vld [vmem:[%s3796_s0 + $0x20] sm:$0xff]  ;;  %v422_v16 = vld [vmem:[#allocation5 + $0x158] sm:$0xff]  ;;  %v3368_v19 = vpack.c.bf16 %v417_v10, %v413_v9 }
  0x3a   :  { %316 = vmatprep.mubr.f32.mxu1 %v3195_v0  ;;  %2328 = vmatprep.subr.bf16.mxu0 %v3334_v58  ;;  %v426_v18 = vld [vmem:[#allocation5 + $0x178] sm:$0xff]  ;;  %v419_v20 = vld [vmem:[#allocation5 + $0x140] sm:$0xff]  ;;  %v3372_v24 = vpack.c.bf16 %v424_v13, %v420_v12  ;;  %v421_v26 = vld [vmem:[#allocation5 + $0x150] sm:$0xff]  ;;  %v3474_v9 = vshrl.u32 %v76_v7, 7 }
  0x3b   :  { %2218 = vmatmul.mubr.msk.f32.gmra.mrb[6].mxu0 %vm96_vm0, %v61_v1  ;;  %2360 = vmatprep.subr.bf16.mxu1 %v3338_v61  ;;  %v423_v23 = vld [vmem:[#allocation5 + $0x160] sm:$0xff]  ;;  %v425_v27 = vld [vmem:[#allocation5 + $0x170] sm:$0xff]  ;;  %v3376_v28 = vpack.c.bf16 %v426_v18, %v422_v16  ;;  %v428_v30 = vld [vmem:[#allocation5 + $0x188] sm:$0xff] }
  0x3c   :  { %2226 = vmatmul.mubr.msk.f32.gmra.mrb[6].mxu1 %vm96_vm0, %v61_v1  ;;  %2330 = vmatpush1.bf16.msra.mxu0 %v3345_v2  ;;  %v432_v31 = vld [vmem:[#allocation5 + $0x1a8] sm:$0xff]  ;;  %v3383_v33 = vpack.c.bf16 %v423_v23, %v419_v20  ;;  %v430_v36 = vld [vmem:[#allocation5 + $0x198] sm:$0xff]  ;;  %v3387_v39 = vpack.c.bf16 %v425_v27, %v421_v26  ;;  %v427_v40 = vld [vmem:[#allocation5 + $0x180] sm:$0xff]  ;;  %v78_v10 = vsub.s32 0, %v3474_v9  ;;  %v82_v13 = vsub.s32 1, %v3474_v9 }
  0x3d   :  { %2362 = vmatpush1.bf16.msra.mxu1 %v3349_v5  ;;  %209 = vmatprep.mubr.f32.mxu0 %v3195_v0  ;;  %v63_v32 = vld [vmem:[%s3796_s0 + $0x28] sm:$0xff]  ;;  %v434_v37 = vld [vmem:[#allocation5 + $0x1b8] sm:$0xff]  ;;  %v431_v41 = vld [vmem:[#allocation5 + $0x1a0] sm:$0xff]  ;;  %v3391_v43 = vpack.c.bf16 %v432_v31, %v428_v30  ;;  %v86_v20 = vsub.s32 2, %v3474_v9 }
  0x3e   :  { %322 = vmatprep.mubr.f32.mxu1 %v3195_v0  ;;  %2332 = vmatprep.subr.bf16.mxu0 %v3353_v8  ;;  %v429_v44 = vld [vmem:[#allocation5 + $0x190] sm:$0xff]  ;;  %v3395_v46 = vpack.c.bf16 %v434_v37, %v430_v36  ;;  %v436_v48 = vld [vmem:[#allocation5 + $0x1c8] sm:$0xff]  ;;  %v3402_v52 = vpack.c.bf16 %v431_v41, %v427_v40  ;;  %v438_v53 = vld [vmem:[#allocation5 + $0x1d8] sm:$0xff]  ;;  %v90_v40 = vsub.s32 3, %v3474_v9 }
  0x3f   :  { %2219 = vmatmul.mubr.msk.f32.gmra.mrb[8].mxu0 %vm96_vm0, %v62_v14  ;;  %2364 = vmatprep.subr.bf16.mxu1 %v3357_v11  ;;  %v433_v45 = vld [vmem:[#allocation5 + $0x1b0] sm:$0xff]  ;;  %v440_v49 = vld [vmem:[#allocation5 + $0x1e8] sm:$0xff]  ;;  %v442_v55 = vld [vmem:[#allocation5 + $0x1f8] sm:$0xff] }
  0x40   :  { %2227 = vmatmul.mubr.msk.f32.gmra.mrb[8].mxu1 %vm96_vm0, %v62_v14  ;;  %2334 = vmatpush1.bf16.msra.mxu0 %v3364_v15  ;;  %v64_v51 = vld [vmem:[%s3796_s0 + $0x30] sm:$0xff]  ;;  %v3406_v56 = vpack.c.bf16 %v433_v45, %v429_v44  ;;  %v435_v57 = vld [vmem:[#allocation5 + $0x1c0] sm:$0xff]  ;;  %v3410_v60 = vpack.c.bf16 %v440_v49, %v436_v48  ;;  %v3414_v1 = vpack.c.bf16 %v442_v55, %v438_v53  ;;  %v65_v3 = vld [vmem:[%s3796_s0 + $0x38] sm:$0xff] }
  0x41   :  { %2366 = vmatpush1.bf16.msra.mxu1 %v3368_v19  ;;  %215 = vmatprep.mubr.f32.mxu0 %v3195_v0  ;;  %v439_v59 = vld [vmem:[#allocation5 + $0x1e0] sm:$0xff]  ;;  %v437_v62 = vld [vmem:[#allocation5 + $0x1d0] sm:$0xff] }
  0x42   :  { %328 = vmatprep.mubr.f32.mxu1 %v3195_v0  ;;  %2336 = vmatprep.subr.bf16.mxu0 %v3372_v24  ;;  %v441_v63 = vld [vmem:[#allocation5 + $0x1f0] sm:$0xff]  ;;  %v3421_v4 = vpack.c.bf16 %v439_v59, %v435_v57  ;;  %v74_v12 = vld [vmem:[%s3799_s3] sm:$0xf] }
  0x43   :  { %2220 = vmatmul.mubr.msk.f32.gmra.mrb[10].mxu0 %vm96_vm0, %v63_v32  ;;  %2368 = vmatprep.subr.bf16.mxu1 %v3376_v28  ;;  %v3425_v6 = vpack.c.bf16 %v441_v63, %v437_v62  ;;  %v3483_v14 = vrot.slane %v74_v12, %v78_v10  ;;  %v3487_v16 = vrot.slane %v74_v12, %v82_v13 }
  0x44   :  { %2228 = vmatmul.mubr.msk.f32.gmra.mrb[10].mxu1 %vm96_vm0, %v63_v32  ;;  %2338 = vmatpush1.bf16.msra.mxu0 %v3383_v33  ;;  %v3494_v36 = vrot.slane %v74_v12, %v86_v20  ;;  %v3500_v44 = vrot.slane %v74_v12, %v90_v40 }
  0x45   :  { %2370 = vmatpush1.bf16.msra.mxu1 %v3387_v39  ;;  %221 = vmatprep.mubr.f32.mxu0 %v3195_v0 }
  0x46   :  { %334 = vmatprep.mubr.f32.mxu1 %v3195_v0  ;;  %2340 = vmatprep.subr.bf16.mxu0 %v3391_v43 }
  0x47   :  { %2221 = vmatmul.mubr.msk.f32.gmra.mrb[12].mxu0 %vm96_vm0, %v64_v51  ;;  %2372 = vmatprep.subr.bf16.mxu1 %v3395_v46 }
  0x48   :  { %2229 = vmatmul.mubr.msk.f32.gmra.mrb[12].mxu1 %vm96_vm0, %v64_v51  ;;  %2342 = vmatpush1.bf16.msra.mxu0 %v3402_v52 }
  0x49   :  { %2374 = vmatpush1.bf16.msra.mxu1 %v3406_v56  ;;  %227 = vmatprep.mubr.f32.mxu0 %v3195_v0 }
  0x4a   :  { %340 = vmatprep.mubr.f32.mxu1 %v3195_v0  ;;  %2344 = vmatprep.subr.bf16.mxu0 %v3410_v60 }
  0x4b   :  { %2222 = vmatmul.mubr.msk.f32.gmra.mrb[14].mxu0 %vm96_vm0, %v65_v3  ;;  %2376 = vmatprep.subr.bf16.mxu1 %v3414_v1 }
  0x4c   :  { %2230 = vmatmul.mubr.msk.f32.gmra.mrb[14].mxu1 %vm96_vm0, %v65_v3  ;;  %2346 = vmatpush1.bf16.msra.mxu0 %v3421_v4 }
  0x4d   :  { %2378 = vmatpush1.bf16.msra.mxu1 %v3425_v6  ;;  %516 = vmatprep.mubr.f32.mxu0 %v3195_v0 }
  0x4e   :  { %587 = vmatprep.mubr.f32.mxu1 %v3195_v0  ;;  %2380 = vmatprep.subr.bf16.mxu0 %v3287_v17 }
  0x4f   :  { %517 = vmatmul.mubr.f32.vlgmr.msra.gmra.mrb[0].mxu0 %v3195_v0  ;;  %2412 = vmatprep.subr.bf16.mxu1 %v3289_v21 }
  0x50   :  { %588 = vmatmul.mubr.f32.vlgmr.msra.gmra.mrb[0].mxu1 %v3195_v0  ;;  %2382 = vmatpush1.bf16.msra.mxu0 %v3291_v22 }
  0x51   :  { %2414 = vmatpush1.bf16.msra.mxu1 %v3294_v25  ;;  %2384 = vmatprep.subr.bf16.mxu0 %v3298_v29 }
  0x52   :  { %2416 = vmatprep.subr.bf16.mxu1 %v3305_v34  ;;  %693 = vmatprep.mubr.f32.mxu0 %v3195_v0 }
  0x53   :  { %764 = vmatprep.mubr.f32.mxu1 %v3195_v0 }
  0x54   :  { %2386 = vmatpush1.bf16.msra.mxu0 %v3307_v35 }
  0x55   :  { %2418 = vmatpush1.bf16.msra.mxu1 %v3311_v38  ;;  %2388 = vmatprep.subr.bf16.mxu0 %v3315_v42 }
  0x56   :  { %2420 = vmatprep.subr.bf16.mxu1 %v3322_v47 }
  0x58   :  { %2390 = vmatpush1.bf16.msra.mxu0 %v3326_v50 }
  0x59   :  { %2422 = vmatpush1.bf16.msra.mxu1 %v3330_v54  ;;  %2392 = vmatprep.subr.bf16.mxu0 %v3334_v58 }
  0x5a   :  { %2424 = vmatprep.subr.bf16.mxu1 %v3338_v61 }
  0x5c   :  { %2394 = vmatpush1.bf16.msra.mxu0 %v3345_v2 }
  0x5d   :  { %2426 = vmatpush1.bf16.msra.mxu1 %v3349_v5  ;;  %2396 = vmatprep.subr.bf16.mxu0 %v3353_v8 }
  0x5e   :  { %2428 = vmatprep.subr.bf16.mxu1 %v3357_v11 }
  0x60   :  { %2398 = vmatpush1.bf16.msra.mxu0 %v3364_v15 }
  0x61   :  { %2430 = vmatpush1.bf16.msra.mxu1 %v3368_v19  ;;  %2400 = vmatprep.subr.bf16.mxu0 %v3372_v24 }
  0x62   :  { %2432 = vmatprep.subr.bf16.mxu1 %v3376_v28 }
  0x64   :  { %2402 = vmatpush1.bf16.msra.mxu0 %v3383_v33 }
  0x65   :  { %2434 = vmatpush1.bf16.msra.mxu1 %v3387_v39  ;;  %2404 = vmatprep.subr.bf16.mxu0 %v3391_v43 }
  0x66   :  { %2436 = vmatprep.subr.bf16.mxu1 %v3395_v46 }
  0x68   :  { %2406 = vmatpush1.bf16.msra.mxu0 %v3402_v52 }
  0x69   :  { %2438 = vmatpush1.bf16.msra.mxu1 %v3406_v56  ;;  %2408 = vmatprep.subr.bf16.mxu0 %v3410_v60 }
  0x6a   :  { %2440 = vmatprep.subr.bf16.mxu1 %v3414_v1 }
  0x6c   :  { %2410 = vmatpush1.bf16.msra.mxu0 %v3421_v4 }
  0x6d   :  { %2442 = vmatpush1.bf16.msra.mxu1 %v3425_v6  ;;  %2444 = vmatprep.subr.bf16.mxu0 %v3287_v17 }
  0x6e   :  { %2476 = vmatprep.subr.bf16.mxu1 %v3289_v21 }
 0x122   :  { %v518_v18 = vpop.f32.mrb[0].mxu0 }
 0x123   :  { %v2915_v23 = vadd.f32 %v518_v18, %v3483_v14  ;;  %v589_v26 = vpop.f32.mrb[0].mxu1  ;;  %v520_v27 = vpop.f32.mrb[1].mxu0 }
 0x124   :  { %v2916_v30 = vadd.f32 %v520_v27, %v3487_v16  ;;  %v591_v31 = vpop.f32.mrb[1].mxu1  ;;  %v2931_v41 = vadd.f32 %v589_v26, %v3494_v36 }
 0x125   :  { %v2231_v32 = vmul.f32 -1.442695, %v2915_v23  ;;  %v2932_v48 = vadd.f32 %v591_v31, %v3500_v44 }
 0x126   :  { %v2232_v37 = vmul.f32 -1.442695, %v2916_v30  ;;  %v2233_v45 = vmul.f32 -1.442695, %v2931_v41 }
 0x127   :  { %2989 = vpow2.f32 %v2231_v32 }
 0x128   :  { %2991 = vpow2.f32 %v2232_v37 }
 0x129   :  { %2993 = vpow2.f32 %v2233_v45 }
 0x12a   :  { %2995 = vtanh.f32 %v2932_v48 }
 0x131   :  { %v2990_v49 = vpop.eup %2989 }
 0x132   :  { %v607_v51 = vadd.f32 1.0, %v2990_v49  ;;  %v2992_v53 = vpop.eup %2991 }
 0x133   :  { %v608_v55 = vadd.f32 1.0, %v2992_v53  ;;  %v2994_v57 = vpop.eup %2993 }
 0x134   :  { %2997 = vrcp.f32 %v607_v51  ;;  %v2996_v59 = vpop.eup %2995  ;;  %v609_v7 = vadd.f32 1.0, %v2994_v57 }
 0x135   :  { %2999 = vrcp.f32 %v608_v55 }
 0x136   :  { %3001 = vrcp.f32 %v609_v7 }
 0x13e   :  { %v2998_v62 = vpop.eup %2997 }
 0x13f   :  { %v618_v63 = vmul.f32 %v2998_v62, %v2996_v59  ;;  %v3000_v3 = vpop.eup %2999 }
 0x140   :  { %v617_v18 = vmul.f32 0.0, %v3000_v3  ;;  %v3002_v23 = vpop.eup %3001 }
 0x142   :  { %v3503_v12 = vadd.f32 %v618_v63, %v617_v18 }
 0x144   :  { %3003 = vtanh.f32 %v3503_v12 }
 0x14e   :  { %v3004_v26 = vpop.eup %3003 }
 0x14f   :  { %v621_v27 = vmul.f32 %v3004_v26, %v3002_v23 }
 0x151   :  { %694 = vmatmul.mubr.f32.vlgmr.msra.gmra.mrb[2].mxu0 %v621_v27  ;;  %765 = vmatmul.mubr.f32.vlgmr.msra.gmra.mrb[2].mxu1 %v621_v27 }
 0x152   :  { %2446 = vmatpush1.bf16.msra.mxu0 %v3291_v22  ;;  %2478 = vmatpush1.bf16.msra.mxu1 %v3294_v25 }
 0x153   :  { %2448 = vmatprep.subr.bf16.mxu0 %v3298_v29  ;;  %2480 = vmatprep.subr.bf16.mxu1 %v3305_v34 }
 0x154   :  { %870 = vmatprep.mubr.f32.mxu0 %v3195_v0  ;;  %941 = vmatprep.mubr.f32.mxu1 %v3195_v0 }
 0x156   :  { %2450 = vmatpush1.bf16.msra.mxu0 %v3307_v35  ;;  %2482 = vmatpush1.bf16.msra.mxu1 %v3311_v38 }
 0x157   :  { %2452 = vmatprep.subr.bf16.mxu0 %v3315_v42  ;;  %2484 = vmatprep.subr.bf16.mxu1 %v3322_v47 }
 0x15a   :  { %2454 = vmatpush1.bf16.msra.mxu0 %v3326_v50  ;;  %2486 = vmatpush1.bf16.msra.mxu1 %v3330_v54 }
 0x15b   :  { %2456 = vmatprep.subr.bf16.mxu0 %v3334_v58  ;;  %2488 = vmatprep.subr.bf16.mxu1 %v3338_v61 }
 0x15e   :  { %2458 = vmatpush1.bf16.msra.mxu0 %v3345_v2  ;;  %2490 = vmatpush1.bf16.msra.mxu1 %v3349_v5 }
 0x15f   :  { %2460 = vmatprep.subr.bf16.mxu0 %v3353_v8  ;;  %2492 = vmatprep.subr.bf16.mxu1 %v3357_v11 }
 0x162   :  { %2462 = vmatpush1.bf16.msra.mxu0 %v3364_v15  ;;  %2494 = vmatpush1.bf16.msra.mxu1 %v3368_v19 }
 0x163   :  { %2464 = vmatprep.subr.bf16.mxu0 %v3372_v24  ;;  %2496 = vmatprep.subr.bf16.mxu1 %v3376_v28 }
 0x166   :  { %2466 = vmatpush1.bf16.msra.mxu0 %v3383_v33  ;;  %2498 = vmatpush1.bf16.msra.mxu1 %v3387_v39 }
 0x167   :  { %2468 = vmatprep.subr.bf16.mxu0 %v3391_v43  ;;  %2500 = vmatprep.subr.bf16.mxu1 %v3395_v46 }
 0x16a   :  { %2470 = vmatpush1.bf16.msra.mxu0 %v3402_v52  ;;  %2502 = vmatpush1.bf16.msra.mxu1 %v3406_v56 }
 0x16b   :  { %2472 = vmatprep.subr.bf16.mxu0 %v3410_v60  ;;  %2504 = vmatprep.subr.bf16.mxu1 %v3414_v1 }
 0x16e   :  { %2474 = vmatpush1.bf16.msra.mxu0 %v3421_v4  ;;  %2506 = vmatpush1.bf16.msra.mxu1 %v3425_v6 }
 0x16f   :  { %2508 = vmatprep.subr.bf16.mxu0 %v3287_v17  ;;  %2540 = vmatprep.subr.bf16.mxu1 %v3289_v21 }
 0x224   :  { %v695_v30 = vpop.f32.mrb[2].mxu0  ;;  %v766_v31 = vpop.f32.mrb[2].mxu1 }
 0x225   :  { %v2917_v32 = vadd.f32 %v695_v30, %v3483_v14  ;;  %v697_v37 = vpop.f32.mrb[3].mxu0  ;;  %v768_v41 = vpop.f32.mrb[3].mxu1  ;;  %v2933_v51 = vadd.f32 %v766_v31, %v3494_v36 }
 0x226   :  { %v2918_v45 = vadd.f32 %v697_v37, %v3487_v16  ;;  %v2934_v53 = vadd.f32 %v768_v41, %v3500_v44 }
 0x227   :  { %v2234_v48 = vmul.f32 -1.442695, %v2917_v32  ;;  %v2236_v55 = vmul.f32 -1.442695, %v2933_v51 }
 0x228   :  { %v2235_v49 = vmul.f32 -1.442695, %v2918_v45 }
 0x229   :  { %3005 = vpow2.f32 %v2234_v48 }
 0x22a   :  { %3007 = vpow2.f32 %v2235_v49 }
 0x22b   :  { %3009 = vtanh.f32 %v2934_v53 }
 0x22c   :  { %3011 = vpow2.f32 %v2236_v55 }
 0x233   :  { %v3006_v57 = vpop.eup %3005 }
 0x234   :  { %v784_v59 = vadd.f32 1.0, %v3006_v57  ;;  %v3008_v62 = vpop.eup %3007 }
 0x235   :  { %v785_v63 = vadd.f32 1.0, %v3008_v62  ;;  %v3010_v3 = vpop.eup %3009 }
 0x236   :  { %3013 = vrcp.f32 %v784_v59  ;;  %v3012_v7 = vpop.eup %3011 }
 0x237   :  { %3015 = vrcp.f32 %v785_v63  ;;  %v786_v27 = vadd.f32 1.0, %v3012_v7 }
 0x239   :  { %3017 = vrcp.f32 %v786_v27 }
 0x240   :  { %v3014_v18 = vpop.eup %3013 }
 0x241   :  { %v795_v23 = vmul.f32 %v3014_v18, %v3010_v3  ;;  %v3016_v26 = vpop.eup %3015 }
 0x242   :  { %v794_v30 = vmul.f32 %v3016_v26, %v3503_v12 }
 0x243   :  { %v3018_v32 = vpop.eup %3017 }
 0x244   :  { %v3545_v31 = vadd.f32 %v795_v23, %v794_v30 }
 0x246   :  { %3019 = vtanh.f32 %v3545_v31 }
 0x250   :  { %v3020_v37 = vpop.eup %3019 }
 0x251   :  { %v798_v41 = vmul.f32 %v3020_v37, %v3018_v32 }
 0x253   :  { %871 = vmatmul.mubr.f32.vlgmr.msra.gmra.mrb[4].mxu0 %v798_v41  ;;  %942 = vmatmul.mubr.f32.vlgmr.msra.gmra.mrb[4].mxu1 %v798_v41 }
 0x254   :  { %2510 = vmatpush1.bf16.msra.mxu0 %v3291_v22  ;;  %2542 = vmatpush1.bf16.msra.mxu1 %v3294_v25 }
 0x255   :  { %2512 = vmatprep.subr.bf16.mxu0 %v3298_v29  ;;  %2544 = vmatprep.subr.bf16.mxu1 %v3305_v34 }
 0x256   :  { %1047 = vmatprep.mubr.f32.mxu0 %v3195_v0  ;;  %1118 = vmatprep.mubr.f32.mxu1 %v3195_v0 }
 0x258   :  { %2514 = vmatpush1.bf16.msra.mxu0 %v3307_v35  ;;  %2546 = vmatpush1.bf16.msra.mxu1 %v3311_v38 }
 0x259   :  { %2516 = vmatprep.subr.bf16.mxu0 %v3315_v42  ;;  %2548 = vmatprep.subr.bf16.mxu1 %v3322_v47 }
 0x25c   :  { %2518 = vmatpush1.bf16.msra.mxu0 %v3326_v50  ;;  %2550 = vmatpush1.bf16.msra.mxu1 %v3330_v54 }
 0x25d   :  { %2520 = vmatprep.subr.bf16.mxu0 %v3334_v58  ;;  %2552 = vmatprep.subr.bf16.mxu1 %v3338_v61 }
 0x260   :  { %2522 = vmatpush1.bf16.msra.mxu0 %v3345_v2  ;;  %2554 = vmatpush1.bf16.msra.mxu1 %v3349_v5 }
 0x261   :  { %2524 = vmatprep.subr.bf16.mxu0 %v3353_v8  ;;  %2556 = vmatprep.subr.bf16.mxu1 %v3357_v11 }
 0x264   :  { %2526 = vmatpush1.bf16.msra.mxu0 %v3364_v15  ;;  %2558 = vmatpush1.bf16.msra.mxu1 %v3368_v19 }
 0x265   :  { %2528 = vmatprep.subr.bf16.mxu0 %v3372_v24  ;;  %2560 = vmatprep.subr.bf16.mxu1 %v3376_v28 }
 0x268   :  { %2530 = vmatpush1.bf16.msra.mxu0 %v3383_v33  ;;  %2562 = vmatpush1.bf16.msra.mxu1 %v3387_v39 }
 0x269   :  { %2532 = vmatprep.subr.bf16.mxu0 %v3391_v43  ;;  %2564 = vmatprep.subr.bf16.mxu1 %v3395_v46 }
 0x26c   :  { %2534 = vmatpush1.bf16.msra.mxu0 %v3402_v52  ;;  %2566 = vmatpush1.bf16.msra.mxu1 %v3406_v56 }
 0x26d   :  { %2536 = vmatprep.subr.bf16.mxu0 %v3410_v60  ;;  %2568 = vmatprep.subr.bf16.mxu1 %v3414_v1 }
 0x270   :  { %2538 = vmatpush1.bf16.msra.mxu0 %v3421_v4  ;;  %2570 = vmatpush1.bf16.msra.mxu1 %v3425_v6 }
 0x271   :  { %2572 = vmatprep.subr.bf16.mxu0 %v3287_v17  ;;  %2604 = vmatprep.subr.bf16.mxu1 %v3289_v21 }
 0x326   :  { %v872_v12 = vpop.f32.mrb[4].mxu0  ;;  %v943_v45 = vpop.f32.mrb[4].mxu1 }
 0x327   :  { %v2919_v48 = vadd.f32 %v872_v12, %v3483_v14  ;;  %v874_v49 = vpop.f32.mrb[5].mxu0  ;;  %v945_v51 = vpop.f32.mrb[5].mxu1  ;;  %v2935_v59 = vadd.f32 %v943_v45, %v3494_v36 }
 0x328   :  { %v2920_v53 = vadd.f32 %v874_v49, %v3487_v16  ;;  %v2936_v62 = vadd.f32 %v945_v51, %v3500_v44 }
 0x329   :  { %v2237_v55 = vmul.f32 -1.442695, %v2919_v48  ;;  %v2239_v63 = vmul.f32 -1.442695, %v2935_v59 }
 0x32a   :  { %v2238_v57 = vmul.f32 -1.442695, %v2920_v53 }
 0x32b   :  { %3021 = vpow2.f32 %v2237_v55 }
 0x32c   :  { %3023 = vpow2.f32 %v2238_v57 }
 0x32d   :  { %3025 = vtanh.f32 %v2936_v62 }
 0x32e   :  { %3027 = vpow2.f32 %v2239_v63 }
 0x335   :  { %v3022_v3 = vpop.eup %3021 }
 0x336   :  { %v961_v7 = vadd.f32 1.0, %v3022_v3  ;;  %v3024_v18 = vpop.eup %3023 }
 0x337   :  { %v962_v23 = vadd.f32 1.0, %v3024_v18  ;;  %v3026_v26 = vpop.eup %3025 }
 0x338   :  { %3029 = vrcp.f32 %v961_v7  ;;  %v3028_v27 = vpop.eup %3027 }
 0x339   :  { %3031 = vrcp.f32 %v962_v23  ;;  %v963_v41 = vadd.f32 1.0, %v3028_v27 }
 0x33b   :  { %3033 = vrcp.f32 %v963_v41 }
 0x342   :  { %v3030_v30 = vpop.eup %3029 }
 0x343   :  { %v972_v32 = vmul.f32 %v3030_v30, %v3026_v26  ;;  %v3032_v37 = vpop.eup %3031 }
 0x344   :  { %v971_v12 = vmul.f32 %v3032_v37, %v3545_v31 }
 0x345   :  { %v3034_v48 = vpop.eup %3033 }
 0x346   :  { %v3587_v45 = vadd.f32 %v972_v32, %v971_v12 }
 0x348   :  { %3035 = vtanh.f32 %v3587_v45 }
 0x352   :  { %v3036_v49 = vpop.eup %3035 }
 0x353   :  { %v975_v51 = vmul.f32 %v3036_v49, %v3034_v48 }
 0x355   :  { %1048 = vmatmul.mubr.f32.vlgmr.msra.gmra.mrb[6].mxu0 %v975_v51  ;;  %1119 = vmatmul.mubr.f32.vlgmr.msra.gmra.mrb[6].mxu1 %v975_v51 }
 0x356   :  { %2574 = vmatpush1.bf16.msra.mxu0 %v3291_v22  ;;  %2606 = vmatpush1.bf16.msra.mxu1 %v3294_v25 }
 0x357   :  { %2576 = vmatprep.subr.bf16.mxu0 %v3298_v29  ;;  %2608 = vmatprep.subr.bf16.mxu1 %v3305_v34 }
 0x358   :  { %1224 = vmatprep.mubr.f32.mxu0 %v3195_v0  ;;  %1295 = vmatprep.mubr.f32.mxu1 %v3195_v0 }
 0x35a   :  { %2578 = vmatpush1.bf16.msra.mxu0 %v3307_v35  ;;  %2610 = vmatpush1.bf16.msra.mxu1 %v3311_v38 }
 0x35b   :  { %2580 = vmatprep.subr.bf16.mxu0 %v3315_v42  ;;  %2612 = vmatprep.subr.bf16.mxu1 %v3322_v47 }
 0x35e   :  { %2582 = vmatpush1.bf16.msra.mxu0 %v3326_v50  ;;  %2614 = vmatpush1.bf16.msra.mxu1 %v3330_v54 }
 0x35f   :  { %2584 = vmatprep.subr.bf16.mxu0 %v3334_v58  ;;  %2616 = vmatprep.subr.bf16.mxu1 %v3338_v61 }
 0x362   :  { %2586 = vmatpush1.bf16.msra.mxu0 %v3345_v2  ;;  %2618 = vmatpush1.bf16.msra.mxu1 %v3349_v5 }
 0x363   :  { %2588 = vmatprep.subr.bf16.mxu0 %v3353_v8  ;;  %2620 = vmatprep.subr.bf16.mxu1 %v3357_v11 }
 0x366   :  { %2590 = vmatpush1.bf16.msra.mxu0 %v3364_v15  ;;  %2622 = vmatpush1.bf16.msra.mxu1 %v3368_v19 }
 0x367   :  { %2592 = vmatprep.subr.bf16.mxu0 %v3372_v24  ;;  %2624 = vmatprep.subr.bf16.mxu1 %v3376_v28 }
 0x36a   :  { %2594 = vmatpush1.bf16.msra.mxu0 %v3383_v33  ;;  %2626 = vmatpush1.bf16.msra.mxu1 %v3387_v39 }
 0x36b   :  { %2596 = vmatprep.subr.bf16.mxu0 %v3391_v43  ;;  %2628 = vmatprep.subr.bf16.mxu1 %v3395_v46 }
 0x36e   :  { %2598 = vmatpush1.bf16.msra.mxu0 %v3402_v52  ;;  %2630 = vmatpush1.bf16.msra.mxu1 %v3406_v56 }
 0x36f   :  { %2600 = vmatprep.subr.bf16.mxu0 %v3410_v60  ;;  %2632 = vmatprep.subr.bf16.mxu1 %v3414_v1 }
 0x372   :  { %2602 = vmatpush1.bf16.msra.mxu0 %v3421_v4  ;;  %2634 = vmatpush1.bf16.msra.mxu1 %v3425_v6 }
 0x373   :  { %2636 = vmatprep.subr.bf16.mxu0 %v3287_v17  ;;  %2668 = vmatprep.subr.bf16.mxu1 %v3289_v21 }
 0x428   :  { %v1049_v31 = vpop.f32.mrb[6].mxu0  ;;  %v1120_v53 = vpop.f32.mrb[6].mxu1 }
 0x429   :  { %v2921_v55 = vadd.f32 %v1049_v31, %v3483_v14  ;;  %v1051_v57 = vpop.f32.mrb[7].mxu0  ;;  %v1122_v59 = vpop.f32.mrb[7].mxu1  ;;  %v2937_v7 = vadd.f32 %v1120_v53, %v3494_v36 }
 0x42a   :  { %v2922_v62 = vadd.f32 %v1051_v57, %v3487_v16  ;;  %v2938_v18 = vadd.f32 %v1122_v59, %v3500_v44 }
 0x42b   :  { %v2240_v63 = vmul.f32 -1.442695, %v2921_v55  ;;  %v2242_v23 = vmul.f32 -1.442695, %v2937_v7 }
 0x42c   :  { %v2241_v3 = vmul.f32 -1.442695, %v2922_v62 }
 0x42d   :  { %3037 = vpow2.f32 %v2240_v63 }
 0x42e   :  { %3039 = vpow2.f32 %v2241_v3 }
 0x42f   :  { %3041 = vtanh.f32 %v2938_v18 }
 0x430   :  { %3043 = vpow2.f32 %v2242_v23 }
 0x437   :  { %v3038_v26 = vpop.eup %3037 }
 0x438   :  { %v1138_v27 = vadd.f32 1.0, %v3038_v26  ;;  %v3040_v30 = vpop.eup %3039 }
 0x439   :  { %v1139_v32 = vadd.f32 1.0, %v3040_v30  ;;  %v3042_v37 = vpop.eup %3041 }
 0x43a   :  { %3045 = vrcp.f32 %v1138_v27  ;;  %v3044_v41 = vpop.eup %3043 }
 0x43b   :  { %3047 = vrcp.f32 %v1139_v32  ;;  %v1140_v51 = vadd.f32 1.0, %v3044_v41 }
 0x43d   :  { %3049 = vrcp.f32 %v1140_v51 }
 0x444   :  { %v3046_v12 = vpop.eup %3045 }
 0x445   :  { %v1149_v48 = vmul.f32 %v3046_v12, %v3042_v37  ;;  %v3048_v49 = vpop.eup %3047 }
 0x446   :  { %v1148_v31 = vmul.f32 %v3048_v49, %v3587_v45 }
 0x447   :  { %v3050_v55 = vpop.eup %3049 }
 0x448   :  { %v3629_v53 = vadd.f32 %v1149_v48, %v1148_v31 }
 0x44a   :  { %3051 = vtanh.f32 %v3629_v53 }
 0x454   :  { %v3052_v57 = vpop.eup %3051 }
 0x455   :  { %v1152_v59 = vmul.f32 %v3052_v57, %v3050_v55 }
 0x457   :  { %1225 = vmatmul.mubr.f32.vlgmr.msra.gmra.mrb[8].mxu0 %v1152_v59  ;;  %1296 = vmatmul.mubr.f32.vlgmr.msra.gmra.mrb[8].mxu1 %v1152_v59 }
 0x458   :  { %2638 = vmatpush1.bf16.msra.mxu0 %v3291_v22  ;;  %2670 = vmatpush1.bf16.msra.mxu1 %v3294_v25 }
 0x459   :  { %2640 = vmatprep.subr.bf16.mxu0 %v3298_v29  ;;  %2672 = vmatprep.subr.bf16.mxu1 %v3305_v34 }
 0x45a   :  { %1401 = vmatprep.mubr.f32.mxu0 %v3195_v0  ;;  %1472 = vmatprep.mubr.f32.mxu1 %v3195_v0 }
 0x45c   :  { %2642 = vmatpush1.bf16.msra.mxu0 %v3307_v35  ;;  %2674 = vmatpush1.bf16.msra.mxu1 %v3311_v38 }
 0x45d   :  { %2644 = vmatprep.subr.bf16.mxu0 %v3315_v42  ;;  %2676 = vmatprep.subr.bf16.mxu1 %v3322_v47 }
 0x460   :  { %2646 = vmatpush1.bf16.msra.mxu0 %v3326_v50  ;;  %2678 = vmatpush1.bf16.msra.mxu1 %v3330_v54 }
 0x461   :  { %2648 = vmatprep.subr.bf16.mxu0 %v3334_v58  ;;  %2680 = vmatprep.subr.bf16.mxu1 %v3338_v61 }
 0x464   :  { %2650 = vmatpush1.bf16.msra.mxu0 %v3345_v2  ;;  %2682 = vmatpush1.bf16.msra.mxu1 %v3349_v5 }
 0x465   :  { %2652 = vmatprep.subr.bf16.mxu0 %v3353_v8  ;;  %2684 = vmatprep.subr.bf16.mxu1 %v3357_v11 }
 0x468   :  { %2654 = vmatpush1.bf16.msra.mxu0 %v3364_v15  ;;  %2686 = vmatpush1.bf16.msra.mxu1 %v3368_v19 }
 0x469   :  { %2656 = vmatprep.subr.bf16.mxu0 %v3372_v24  ;;  %2688 = vmatprep.subr.bf16.mxu1 %v3376_v28 }
 0x46c   :  { %2658 = vmatpush1.bf16.msra.mxu0 %v3383_v33  ;;  %2690 = vmatpush1.bf16.msra.mxu1 %v3387_v39 }
 0x46d   :  { %2660 = vmatprep.subr.bf16.mxu0 %v3391_v43  ;;  %2692 = vmatprep.subr.bf16.mxu1 %v3395_v46 }
 0x470   :  { %2662 = vmatpush1.bf16.msra.mxu0 %v3402_v52  ;;  %2694 = vmatpush1.bf16.msra.mxu1 %v3406_v56 }
 0x471   :  { %2664 = vmatprep.subr.bf16.mxu0 %v3410_v60  ;;  %2696 = vmatprep.subr.bf16.mxu1 %v3414_v1 }
 0x474   :  { %2666 = vmatpush1.bf16.msra.mxu0 %v3421_v4  ;;  %2698 = vmatpush1.bf16.msra.mxu1 %v3425_v6 }
 0x475   :  { %2700 = vmatprep.subr.bf16.mxu0 %v3287_v17  ;;  %2732 = vmatprep.subr.bf16.mxu1 %v3289_v21 }
 0x52a   :  { %v1226_v45 = vpop.f32.mrb[8].mxu0  ;;  %v1297_v62 = vpop.f32.mrb[8].mxu1 }
 0x52b   :  { %v2923_v63 = vadd.f32 %v1226_v45, %v3483_v14  ;;  %v1228_v3 = vpop.f32.mrb[9].mxu0  ;;  %v1299_v7 = vpop.f32.mrb[9].mxu1  ;;  %v2939_v27 = vadd.f32 %v1297_v62, %v3494_v36 }
 0x52c   :  { %v2924_v18 = vadd.f32 %v1228_v3, %v3487_v16  ;;  %v2940_v30 = vadd.f32 %v1299_v7, %v3500_v44 }
 0x52d   :  { %v2243_v23 = vmul.f32 -1.442695, %v2923_v63  ;;  %v2245_v32 = vmul.f32 -1.442695, %v2939_v27 }
 0x52e   :  { %v2244_v26 = vmul.f32 -1.442695, %v2924_v18 }
 0x52f   :  { %3053 = vpow2.f32 %v2243_v23 }
 0x530   :  { %3055 = vpow2.f32 %v2244_v26 }
 0x531   :  { %3057 = vtanh.f32 %v2940_v30 }
 0x532   :  { %3059 = vpow2.f32 %v2245_v32 }
 0x539   :  { %v3054_v37 = vpop.eup %3053 }
 0x53a   :  { %v1315_v41 = vadd.f32 1.0, %v3054_v37  ;;  %v3056_v12 = vpop.eup %3055 }
 0x53b   :  { %v1316_v48 = vadd.f32 1.0, %v3056_v12  ;;  %v3058_v49 = vpop.eup %3057 }
 0x53c   :  { %3061 = vrcp.f32 %v1315_v41  ;;  %v3060_v51 = vpop.eup %3059 }
 0x53d   :  { %3063 = vrcp.f32 %v1316_v48  ;;  %v1317_v59 = vadd.f32 1.0, %v3060_v51 }
 0x53f   :  { %3065 = vrcp.f32 %v1317_v59 }
 0x546   :  { %v3062_v31 = vpop.eup %3061 }
 0x547   :  { %v1326_v55 = vmul.f32 %v3062_v31, %v3058_v49  ;;  %v3064_v57 = vpop.eup %3063 }
 0x548   :  { %v1325_v45 = vmul.f32 %v3064_v57, %v3629_v53 }
 0x549   :  { %v3066_v63 = vpop.eup %3065 }
 0x54a   :  { %v3671_v62 = vadd.f32 %v1326_v55, %v1325_v45 }
 0x54c   :  { %3067 = vtanh.f32 %v3671_v62 }
 0x556   :  { %v3068_v3 = vpop.eup %3067 }
 0x557   :  { %v1329_v7 = vmul.f32 %v3068_v3, %v3066_v63 }
 0x559   :  { %1402 = vmatmul.mubr.f32.vlgmr.msra.gmra.mrb[10].mxu0 %v1329_v7  ;;  %1473 = vmatmul.mubr.f32.vlgmr.msra.gmra.mrb[10].mxu1 %v1329_v7 }
 0x55a   :  { %2702 = vmatpush1.bf16.msra.mxu0 %v3291_v22  ;;  %2734 = vmatpush1.bf16.msra.mxu1 %v3294_v25 }
 0x55b   :  { %2704 = vmatprep.subr.bf16.mxu0 %v3298_v29  ;;  %2736 = vmatprep.subr.bf16.mxu1 %v3305_v34 }
 0x55c   :  { %1578 = vmatprep.mubr.f32.mxu0 %v3195_v0  ;;  %1649 = vmatprep.mubr.f32.mxu1 %v3195_v0 }
 0x55e   :  { %2706 = vmatpush1.bf16.msra.mxu0 %v3307_v35  ;;  %2738 = vmatpush1.bf16.msra.mxu1 %v3311_v38 }
 0x55f   :  { %2708 = vmatprep.subr.bf16.mxu0 %v3315_v42  ;;  %2740 = vmatprep.subr.bf16.mxu1 %v3322_v47 }
 0x562   :  { %2710 = vmatpush1.bf16.msra.mxu0 %v3326_v50  ;;  %2742 = vmatpush1.bf16.msra.mxu1 %v3330_v54 }
 0x563   :  { %2712 = vmatprep.subr.bf16.mxu0 %v3334_v58  ;;  %2744 = vmatprep.subr.bf16.mxu1 %v3338_v61 }
 0x566   :  { %2714 = vmatpush1.bf16.msra.mxu0 %v3345_v2  ;;  %2746 = vmatpush1.bf16.msra.mxu1 %v3349_v5 }
 0x567   :  { %2716 = vmatprep.subr.bf16.mxu0 %v3353_v8  ;;  %2748 = vmatprep.subr.bf16.mxu1 %v3357_v11 }
 0x56a   :  { %2718 = vmatpush1.bf16.msra.mxu0 %v3364_v15  ;;  %2750 = vmatpush1.bf16.msra.mxu1 %v3368_v19 }
 0x56b   :  { %2720 = vmatprep.subr.bf16.mxu0 %v3372_v24  ;;  %2752 = vmatprep.subr.bf16.mxu1 %v3376_v28 }
 0x56e   :  { %2722 = vmatpush1.bf16.msra.mxu0 %v3383_v33  ;;  %2754 = vmatpush1.bf16.msra.mxu1 %v3387_v39 }
 0x56f   :  { %2724 = vmatprep.subr.bf16.mxu0 %v3391_v43  ;;  %2756 = vmatprep.subr.bf16.mxu1 %v3395_v46 }
 0x572   :  { %2726 = vmatpush1.bf16.msra.mxu0 %v3402_v52  ;;  %2758 = vmatpush1.bf16.msra.mxu1 %v3406_v56 }
 0x573   :  { %2728 = vmatprep.subr.bf16.mxu0 %v3410_v60  ;;  %2760 = vmatprep.subr.bf16.mxu1 %v3414_v1 }
 0x576   :  { %2730 = vmatpush1.bf16.msra.mxu0 %v3421_v4  ;;  %2762 = vmatpush1.bf16.msra.mxu1 %v3425_v6 }
 0x577   :  { %2764 = vmatprep.subr.bf16.mxu0 %v3287_v17  ;;  %2796 = vmatprep.subr.bf16.mxu1 %v3289_v21 }
 0x62c   :  { %v1403_v53 = vpop.f32.mrb[10].mxu0  ;;  %v1474_v18 = vpop.f32.mrb[10].mxu1 }
 0x62d   :  { %v2925_v23 = vadd.f32 %v1403_v53, %v3483_v14  ;;  %v1405_v26 = vpop.f32.mrb[11].mxu0  ;;  %v1476_v27 = vpop.f32.mrb[11].mxu1  ;;  %v2941_v41 = vadd.f32 %v1474_v18, %v3494_v36 }
 0x62e   :  { %v2926_v30 = vadd.f32 %v1405_v26, %v3487_v16  ;;  %v2942_v12 = vadd.f32 %v1476_v27, %v3500_v44  ;;  %v1871_v26 = vld [vmem:[#allocation8 + $0x18] sm:$0xff] }
 0x62f   :  { %v2246_v32 = vmul.f32 -1.442695, %v2925_v23  ;;  %v2248_v48 = vmul.f32 -1.442695, %v2941_v41 }
 0x630   :  { %v2247_v37 = vmul.f32 -1.442695, %v2926_v30  ;;  %v1876_v30 = vld [vmem:[#allocation8 + $0x40] sm:$0xff] }
 0x631   :  { %3069 = vpow2.f32 %v2246_v32  ;;  %v1870_v32 = vld [vmem:[#allocation8 + $0x10] sm:$0xff]  ;;  %v2859_v41 = vpack.c.bf16 %v1876_v30, %v1871_v26  ;;  %v1919_v30 = vld [vmem:[#allocation8 + $0x198] sm:$0xff] }
 0x632   :  { %3071 = vpow2.f32 %v2247_v37  ;;  %v1875_v37 = vld [vmem:[#allocation8 + $0x38] sm:$0xff] }
 0x633   :  { %3073 = vtanh.f32 %v2942_v12  ;;  %v2861_v12 = vpack.c.bf16 %v1875_v37, %v1870_v32  ;;  %v1924_v32 = vld [vmem:[#allocation8 + $0x1c0] sm:$0xff] }
 0x634   :  { %3075 = vpow2.f32 %v2248_v48  ;;  %v1879_v48 = vld [vmem:[#allocation8 + $0x58] sm:$0xff]  ;;  %v2847_v37 = vpack.c.bf16 %v1924_v32, %v1919_v30 }
 0x63b   :  { %v3070_v17 = vpop.eup %3069 }
 0x63c   :  { %v1492_v49 = vadd.f32 1.0, %v3070_v17  ;;  %v3072_v21 = vpop.eup %3071  ;;  %v1884_v17 = vld [vmem:[#allocation8 + $0x80] sm:$0xff] }
 0x63d   :  { %v1493_v51 = vadd.f32 1.0, %v3072_v21  ;;  %v3074_v31 = vpop.eup %3073  ;;  %v1878_v21 = vld [vmem:[#allocation8 + $0x50] sm:$0xff] }
 0x63e   :  { %3077 = vrcp.f32 %v1492_v49  ;;  %v3076_v55 = vpop.eup %3075  ;;  %v2831_v49 = vpack.c.bf16 %v1884_v17, %v1879_v48  ;;  %v1921_v48 = vld [vmem:[#allocation8 + $0x1a8] sm:$0xff] }
 0x63f   :  { %3079 = vrcp.f32 %v1493_v51  ;;  %v1494_v63 = vadd.f32 1.0, %v3076_v55  ;;  %v1883_v51 = vld [vmem:[#allocation8 + $0x78] sm:$0xff] }
 0x640   :  { %v2833_v55 = vpack.c.bf16 %v1883_v51, %v1878_v21  ;;  %v1920_v21 = vld [vmem:[#allocation8 + $0x1a0] sm:$0xff]  ;;  %v1925_v51 = vld [vmem:[#allocation8 + $0x1c8] sm:$0xff] }
 0x641   :  { %3081 = vrcp.f32 %v1494_v63 }
 0x648   :  { %v3078_v57 = vpop.eup %3077 }
 0x649   :  { %v1503_v59 = vmul.f32 %v3078_v57, %v3074_v31  ;;  %v3080_v45 = vpop.eup %3079  ;;  %v1881_v31 = vld [vmem:[#allocation8 + $0x68] sm:$0xff]  ;;  %v1886_v57 = vld [vmem:[#allocation8 + $0x90] sm:$0xff] }
 0x64a   :  { %v1502_v3 = vmul.f32 %v3080_v45, %v3671_v62  ;;  %v1873_v62 = vld [vmem:[#allocation8 + $0x28] sm:$0xff]  ;;  %v2863_v63 = vpack.c.bf16 %v1886_v57, %v1881_v31 }
 0x64b   :  { %v3082_v53 = vpop.eup %3081  ;;  %v1885_v45 = vld [vmem:[#allocation8 + $0x88] sm:$0xff] }
 0x64c   :  { %v3713_v7 = vadd.f32 %v1503_v59, %v1502_v3  ;;  %v1880_v59 = vld [vmem:[#allocation8 + $0x60] sm:$0xff]  ;;  %v1929_v57 = vld [vmem:[#allocation8 + $0x1e8] sm:$0xff] }
 0x64d   :  { %v2865_v3 = vpack.c.bf16 %v1885_v45, %v1880_v59  ;;  %v1934_v59 = vld [vmem:[#allocation8 + $0x210] sm:$0xff]  ;;  %v1928_v45 = vld [vmem:[#allocation8 + $0x1e0] sm:$0xff] }
 0x64e   :  { %3083 = vtanh.f32 %v3713_v7 }
 0x658   :  { %v3084_v18 = vpop.eup %3083 }
 0x659   :  { %v1506_v23 = vmul.f32 %v3084_v18, %v3082_v53  ;;  %v1894_v53 = vld [vmem:[#allocation8 + $0xd0] sm:$0xff] }
 0x65b   :  { %1579 = vmatmul.mubr.f32.vlgmr.msra.gmra.mrb[12].mxu0 %v1506_v23  ;;  %1650 = vmatmul.mubr.f32.vlgmr.msra.gmra.mrb[12].mxu1 %v1506_v23  ;;  %v1888_v23 = vld [vmem:[#allocation8 + $0xa0] sm:$0xff] }
 0x65c   :  { %2766 = vmatpush1.bf16.msra.mxu0 %v3291_v22  ;;  %2798 = vmatpush1.bf16.msra.mxu1 %v3294_v25 }
 0x65d   :  { %2768 = vmatprep.subr.bf16.mxu0 %v3298_v29  ;;  %2800 = vmatprep.subr.bf16.mxu1 %v3305_v34 }
 0x65e   :  { %1755 = vmatprep.mubr.f32.mxu0 %v3195_v0  ;;  %1826 = vmatprep.mubr.f32.mxu1 %v3195_v0 }
 0x660   :  { %2770 = vmatpush1.bf16.msra.mxu0 %v3307_v35  ;;  %2802 = vmatpush1.bf16.msra.mxu1 %v3311_v38 }
 0x661   :  { %2772 = vmatprep.subr.bf16.mxu0 %v3315_v42  ;;  %2804 = vmatprep.subr.bf16.mxu1 %v3322_v47 }
 0x664   :  { %2774 = vmatpush1.bf16.msra.mxu0 %v3326_v50  ;;  %2806 = vmatpush1.bf16.msra.mxu1 %v3330_v54 }
 0x665   :  { %2776 = vmatprep.subr.bf16.mxu0 %v3334_v58  ;;  %2808 = vmatprep.subr.bf16.mxu1 %v3338_v61 }
 0x668   :  { %2778 = vmatpush1.bf16.msra.mxu0 %v3345_v2  ;;  %2810 = vmatpush1.bf16.msra.mxu1 %v3349_v5 }
 0x669   :  { %2780 = vmatprep.subr.bf16.mxu0 %v3353_v8  ;;  %2812 = vmatprep.subr.bf16.mxu1 %v3357_v11 }
 0x66c   :  { %2782 = vmatpush1.bf16.msra.mxu0 %v3364_v15  ;;  %2814 = vmatpush1.bf16.msra.mxu1 %v3368_v19 }
 0x66d   :  { %2784 = vmatprep.subr.bf16.mxu0 %v3372_v24  ;;  %2816 = vmatprep.subr.bf16.mxu1 %v3376_v28 }
 0x670   :  { %2786 = vmatpush1.bf16.msra.mxu0 %v3383_v33  ;;  %2818 = vmatpush1.bf16.msra.mxu1 %v3387_v39 }
 0x671   :  { %2788 = vmatprep.subr.bf16.mxu0 %v3391_v43  ;;  %2820 = vmatprep.subr.bf16.mxu1 %v3395_v46 }
 0x674   :  { %2790 = vmatpush1.bf16.msra.mxu0 %v3402_v52  ;;  %2822 = vmatpush1.bf16.msra.mxu1 %v3406_v56 }
 0x675   :  { %2792 = vmatprep.subr.bf16.mxu0 %v3410_v60  ;;  %2824 = vmatprep.subr.bf16.mxu1 %v3414_v1  ;;  %v1869_v60 = vld [vmem:[#allocation8 + $0x8] sm:$0xff]  ;;  %v1874_v1 = vld [vmem:[#allocation8 + $0x30] sm:$0xff] }
 0x678   :  { %2794 = vmatpush1.bf16.msra.mxu0 %v3421_v4  ;;  %2826 = vmatpush1.bf16.msra.mxu1 %v3425_v6  ;;  %v2827_v4 = vpack.c.bf16 %v1874_v1, %v1869_v60  ;;  %v1868_v6 = vld [vmem:[#allocation8] sm:$0xff]  ;;  %v1911_v60 = vld [vmem:[#allocation8 + $0x158] sm:$0xff] }
 0x679   :  { %v2829_v27 = vpack.c.bf16 %v1873_v62, %v1868_v6  ;;  %2860 = vmatprep.subr.bf16.mxu1 %v2859_v41  ;;  %v1910_v6 = vld [vmem:[#allocation8 + $0x150] sm:$0xff]  ;;  %v1915_v62 = vld [vmem:[#allocation8 + $0x178] sm:$0xff] }
 0x67a   :  { %2828 = vmatprep.subr.bf16.mxu0 %v2827_v4  ;;  %v1916_v4 = vld [vmem:[#allocation8 + $0x180] sm:$0xff]  ;;  %v1918_v41 = vld [vmem:[#allocation8 + $0x190] sm:$0xff] }
 0x67b   :  { %v2875_v26 = vpack.c.bf16 %v1916_v4, %v1911_v60 }
 0x72e   :  { %v1580_v22 = vpop.f32.mrb[12].mxu0  ;;  %v1651_v25 = vpop.f32.mrb[12].mxu1 }
 0x72f   :  { %v2927_v29 = vadd.f32 %v1580_v22, %v3483_v14  ;;  %v1582_v34 = vpop.f32.mrb[13].mxu0  ;;  %v1653_v35 = vpop.f32.mrb[13].mxu1  ;;  %v2943_v50 = vadd.f32 %v1651_v25, %v3494_v36  ;;  %v1893_v22 = vld [vmem:[#allocation8 + $0xc8] sm:$0xff]  ;;  %v1891_v25 = vld [vmem:[#allocation8 + $0xb8] sm:$0xff] }
 0x730   :  { %v2928_v38 = vadd.f32 %v1582_v34, %v3487_v16  ;;  %v2944_v54 = vadd.f32 %v1653_v35, %v3500_v44  ;;  %v1896_v34 = vld [vmem:[#allocation8 + $0xe0] sm:$0xff]  ;;  %v1890_v35 = vld [vmem:[#allocation8 + $0xb0] sm:$0xff] }
 0x731   :  { %v2249_v42 = vmul.f32 -1.442695, %v2927_v29  ;;  %v2251_v58 = vmul.f32 -1.442695, %v2943_v50  ;;  %v2837_v29 = vpack.c.bf16 %v1893_v22, %v1888_v23  ;;  %v1899_v50 = vld [vmem:[#allocation8 + $0xf8] sm:$0xff]  ;;  %v1930_v22 = vld [vmem:[#allocation8 + $0x1f0] sm:$0xff] }
 0x732   :  { %v2250_v47 = vmul.f32 -1.442695, %v2928_v38  ;;  %v1895_v38 = vld [vmem:[#allocation8 + $0xd8] sm:$0xff] }
 0x733   :  { %3085 = vpow2.f32 %v2249_v42  ;;  %v2867_v42 = vpack.c.bf16 %v1896_v34, %v1891_v25  ;;  %v1935_v25 = vld [vmem:[#allocation8 + $0x218] sm:$0xff] }
 0x734   :  { %3087 = vpow2.f32 %v2250_v47  ;;  %v2869_v47 = vpack.c.bf16 %v1895_v38, %v1890_v35  ;;  %v2885_v34 = vpack.c.bf16 %v1935_v25, %v1930_v22  ;;  %v1944_v35 = vld [vmem:[#allocation8 + $0x260] sm:$0xff]  ;;  %v1938_v38 = vld [vmem:[#allocation8 + $0x230] sm:$0xff]  ;;  %v1927_v22 = vld [vmem:[#allocation8 + $0x1d8] sm:$0xff] }
 0x735   :  { %3089 = vtanh.f32 %v2944_v54  ;;  %v1904_v54 = vld [vmem:[#allocation8 + $0x120] sm:$0xff] }
 0x736   :  { %3091 = vpow2.f32 %v2251_v58  ;;  %v2839_v58 = vpack.c.bf16 %v1904_v54, %v1899_v50  ;;  %v1941_v50 = vld [vmem:[#allocation8 + $0x248] sm:$0xff]  ;;  %v1946_v54 = vld [vmem:[#allocation8 + $0x270] sm:$0xff] }
 0x73d   :  { %v3086_v61 = vpop.eup %3085 }
 0x73e   :  { %v1669_v2 = vadd.f32 1.0, %v3086_v61  ;;  %v3088_v5 = vpop.eup %3087  ;;  %v1898_v61 = vld [vmem:[#allocation8 + $0xf0] sm:$0xff] }
 0x73f   :  { %v1670_v8 = vadd.f32 1.0, %v3088_v5  ;;  %v3090_v11 = vpop.eup %3089  ;;  %v1901_v5 = vld [vmem:[#allocation8 + $0x108] sm:$0xff] }
 0x740   :  { %3093 = vrcp.f32 %v1669_v2  ;;  %v3092_v15 = vpop.eup %3091  ;;  %v1903_v2 = vld [vmem:[#allocation8 + $0x118] sm:$0xff] }
 0x741   :  { %3095 = vrcp.f32 %v1670_v8  ;;  %v1671_v33 = vadd.f32 1.0, %v3092_v15  ;;  %v2841_v8 = vpack.c.bf16 %v1903_v2, %v1898_v61  ;;  %v1900_v15 = vld [vmem:[#allocation8 + $0x100] sm:$0xff]  ;;  %v2887_v2 = vpack.c.bf16 %v1946_v54, %v1941_v50 }
 0x742   :  { %v1948_v50 = vld [vmem:[%s3801_s5] sm:$0x1f]  ;;  %s3198_s5 = smov [#allocation10]  }
 0x743   :  { %3097 = vrcp.f32 %v1671_v33  ;;  %v1909_v33 = vld [vmem:[#allocation8 + $0x148] sm:$0xff]  ;;  %v1953_v54 = vrot.slane %v1948_v50, %v78_v10  ;;  %v1968_v10 = vsub.s32 4, %v3474_v9  ;;  %s2198_s30 = sshll.u32 %s3198_s5, 4  ;;  %s2199_s30 = int_to_ptr.vmem [resolvable:$true] %s2198_s30 }
 0x744   :  { %s3161_s7 = scalar_lea.vmem %s2199_s30, 640  ;;  %p3166_p3 = scmp.lt.s32.totalorder %s2199_s30, %s2199_s30 }
 0x745   :  { %p3162_p2 = scmp.ne.s32.totalorder %s2199_s30, %s3161_s7  ;;  %p3167_p4 = scmp.lt.s32.totalorder %s3161_s7, %s3161_s7 }
 0x747   :  { %p3168_p5 = por %p3167_p4, %p3166_p3 }
 0x749   :  { %p3169_p6 = pnand %p3168_p5, %p3162_p2 }
 0x74a   :  { %v3094_v19 = vpop.eup %3093 }
 0x74b   :  { %v1680_v24 = vmul.f32 %v3094_v19, %v3090_v11  ;;  %v3096_v28 = vpop.eup %3095  ;;  %v1906_v11 = vld [vmem:[#allocation8 + $0x130] sm:$0xff]  ;;  %v1905_v19 = vld [vmem:[#allocation8 + $0x128] sm:$0xff] }
 0x74c   :  { %v1679_v39 = vmul.f32 %v3096_v28, %v3713_v7  ;;  %v1889_v7 = vld [vmem:[#allocation8 + $0xa8] sm:$0xff]  ;;  %v2873_v28 = vpack.c.bf16 %v1905_v19, %v1900_v15 }
 0x74d   :  { %v3098_v46 = vpop.eup %3097  ;;  %v2835_v18 = vpack.c.bf16 %v1894_v53, %v1889_v7  ;;  %v1931_v7 = vld [vmem:[#allocation8 + $0x1f8] sm:$0xff]  ;;  %v1936_v53 = vld [vmem:[#allocation8 + $0x220] sm:$0xff] }
 0x74e   :  { %v3753_v43 = vadd.f32 %v1680_v24, %v1679_v39  ;;  %v2871_v24 = vpack.c.bf16 %v1906_v11, %v1901_v5  ;;  %v1914_v39 = vld [vmem:[#allocation8 + $0x170] sm:$0xff]  ;;  %v2883_v23 = vpack.c.bf16 %v1936_v53, %v1931_v7  ;;  %v1945_v5 = vld [vmem:[#allocation8 + $0x268] sm:$0xff]  ;;  %v3196_v11 = vmov 0.0|0.0   ;;  %v1912_v53 = vld [vmem:[#allocation8 + $0x160] sm:$0xff] }
 0x750   :  { %3099 = vtanh.f32 %v3753_v43 }
 0x75a   :  { %v3100_v52 = vpop.eup %3099 }
 0x75b   :  { %v1683_v56 = vmul.f32 %v3100_v52, %v3098_v46  ;;  %v2843_v46 = vpack.c.bf16 %v1914_v39, %v1909_v33  ;;  %v1908_v52 = vld [vmem:[#allocation8 + $0x140] sm:$0xff] }
 0x75d   :  { %1756 = vmatmul.mubr.f32.vlgmr.msra.gmra.mrb[14].mxu0 %v1683_v56  ;;  %1827 = vmatmul.mubr.f32.vlgmr.msra.gmra.mrb[14].mxu1 %v1683_v56  ;;  %v1913_v56 = vld [vmem:[#allocation8 + $0x168] sm:$0xff] }
 0x75e   :  { %2039 = vmatprep.mubr.f32.mxu0 %v3195_v0  ;;  %2110 = vmatprep.mubr.f32.mxu1 %v3195_v0  ;;  %v2845_v1 = vpack.c.bf16 %v1913_v56, %v1908_v52 }
 0x75f   :  { %2830 = vmatpush1.bf16.msra.mxu0 %v2829_v27  ;;  %2862 = vmatpush1.bf16.msra.mxu1 %v2861_v12  ;;  %v2877_v27 = vpack.c.bf16 %v1915_v62, %v1910_v6  ;;  %v1923_v12 = vld [vmem:[#allocation8 + $0x1b8] sm:$0xff] }
 0x760   :  { %2832 = vmatprep.subr.bf16.mxu0 %v2831_v49  ;;  %2864 = vmatprep.subr.bf16.mxu1 %v2863_v63  ;;  %v2849_v17 = vpack.c.bf16 %v1923_v12, %v1918_v41  ;;  %v1926_v49 = vld [vmem:[#allocation8 + $0x1d0] sm:$0xff]  ;;  %v2851_v63 = vpack.c.bf16 %v1934_v59, %v1929_v57  ;;  %v1872_v12 = vld [vmem:[#allocation8 + $0x20] sm:$0xff]  ;;  %v1897_v59 = vld [vmem:[#allocation8 + $0xe8] sm:$0xff] }
 0x761   :  { %v2879_v31 = vpack.c.bf16 %v1926_v49, %v1921_v48  ;;  %v1877_v48 = vld [vmem:[#allocation8 + $0x48] sm:$0xff] }
 0x763   :  { %2834 = vmatpush1.bf16.msra.mxu0 %v2833_v55  ;;  %2866 = vmatpush1.bf16.msra.mxu1 %v2865_v3  ;;  %v2881_v55 = vpack.c.bf16 %v1925_v51, %v1920_v21  ;;  %v1933_v3 = vld [vmem:[#allocation8 + $0x208] sm:$0xff]  ;;  %v2892_v21 = vpack.c.bf16 %v1877_v48, %v1872_v12 }
 0x764   :  { %2836 = vmatprep.subr.bf16.mxu0 %v2835_v18  ;;  %2868 = vmatprep.subr.bf16.mxu1 %v2867_v42  ;;  %v2853_v18 = vpack.c.bf16 %v1933_v3, %v1928_v45  ;;  %v1943_v42 = vld [vmem:[#allocation8 + $0x258] sm:$0xff] }
 0x765   :  { %v2857_v61 = vpack.c.bf16 %v1943_v42, %v1938_v38  ;;  %v1907_v3 = vld [vmem:[#allocation8 + $0x138] sm:$0xff]  ;;  %v1942_v38 = vld [vmem:[#allocation8 + $0x250] sm:$0xff] }
 0x766   :  { %v1947_v42 = vld [vmem:[#allocation8 + $0x278] sm:$0xff] }
 0x767   :  { %2838 = vmatpush1.bf16.msra.mxu0 %v2837_v29  ;;  %2870 = vmatpush1.bf16.msra.mxu1 %v2869_v47  ;;  %v1939_v29 = vld [vmem:[#allocation8 + $0x238] sm:$0xff] }
 0x768   :  { %2840 = vmatprep.subr.bf16.mxu0 %v2839_v58  ;;  %2872 = vmatprep.subr.bf16.mxu1 %v2871_v24  ;;  %v2855_v47 = vpack.c.bf16 %v1944_v35, %v1939_v29  ;;  %v1940_v58 = vld [vmem:[#allocation8 + $0x240] sm:$0xff] }
 0x769   :  { %v1932_v29 = vld [vmem:[#allocation8 + $0x200] sm:$0xff] }
 0x76b   :  { %2842 = vmatpush1.bf16.msra.mxu0 %v2841_v8  ;;  %2874 = vmatpush1.bf16.msra.mxu1 %v2873_v28  ;;  %v2889_v8 = vpack.c.bf16 %v1945_v5, %v1940_v58  ;;  %v1961_v58 = vrot.slane %v1948_v50, %v86_v20  ;;  %v1969_v20 = vrot.slane %v1948_v50, %v1968_v10 }
 0x76c   :  { %2844 = vmatprep.subr.bf16.mxu0 %v2843_v46  ;;  %2876 = vmatprep.subr.bf16.mxu1 %v2875_v26 }
 0x76f   :  { %2846 = vmatpush1.bf16.msra.mxu0 %v2845_v1  ;;  %2878 = vmatpush1.bf16.msra.mxu1 %v2877_v27 }
 0x770   :  { %2848 = vmatprep.subr.bf16.mxu0 %v2847_v37  ;;  %2880 = vmatprep.subr.bf16.mxu1 %v2879_v31  ;;  %v1882_v31 = vld [vmem:[#allocation8 + $0x70] sm:$0xff] }
 0x773   :  { %2850 = vmatpush1.bf16.msra.mxu0 %v2849_v17  ;;  %2882 = vmatpush1.bf16.msra.mxu1 %v2881_v55  ;;  %v1887_v55 = vld [vmem:[#allocation8 + $0x98] sm:$0xff] }
 0x774   :  { %2852 = vmatprep.subr.bf16.mxu0 %v2851_v63  ;;  %2884 = vmatprep.subr.bf16.mxu1 %v2883_v23  ;;  %v2895_v57 = vpack.c.bf16 %v1887_v55, %v1882_v31  ;;  %v1902_v63 = vld [vmem:[#allocation8 + $0x110] sm:$0xff] }
 0x775   :  { %v2901_v7 = vpack.c.bf16 %v1907_v3, %v1902_v63 }
 0x777   :  { %2854 = vmatpush1.bf16.msra.mxu0 %v2853_v18  ;;  %2886 = vmatpush1.bf16.msra.mxu1 %v2885_v34  ;;  %v1917_v18 = vld [vmem:[#allocation8 + $0x188] sm:$0xff] }
 0x778   :  { %2856 = vmatprep.subr.bf16.mxu0 %v2855_v47  ;;  %2888 = vmatprep.subr.bf16.mxu1 %v2887_v2  ;;  %v2904_v23 = vpack.c.bf16 %v1917_v18, %v1912_v53  ;;  %v1937_v34 = vld [vmem:[#allocation8 + $0x228] sm:$0xff]  ;;  %v2913_v47 = vpack.c.bf16 %v1947_v42, %v1942_v38  ;;  %v1965_v2 = vrot.slane %v1948_v50, %v90_v40 }
 0x779   :  { %v2910_v35 = vpack.c.bf16 %v1937_v34, %v1932_v29 }
 0x77b   :  { %2858 = vmatpush1.bf16.msra.mxu0 %v2857_v61  ;;  %2890 = vmatpush1.bf16.msra.mxu1 %v2889_v8  ;;  %v1957_v61 = vrot.slane %v1948_v50, %v82_v13 }
 0x77c   :  { %2891 = vmatprep.subr.bf16.mxu0 %v3196_v11 }
 0x830   :  { %v1757_v15 = vpop.f32.mrb[14].mxu0  ;;  %v1828_v19 = vpop.f32.mrb[14].mxu1 }
 0x831   :  { %v2929_v24 = vadd.f32 %v1757_v15, %v3483_v14  ;;  %v1759_v28 = vpop.f32.mrb[15].mxu0  ;;  %v1830_v33 = vpop.f32.mrb[15].mxu1  ;;  %v2945_v56 = vadd.f32 %v1828_v19, %v3494_v36 }
 0x832   :  { %v2930_v39 = vadd.f32 %v1759_v28, %v3487_v16  ;;  %v2946_v60 = vadd.f32 %v1830_v33, %v3500_v44 }
 0x833   :  { %v2252_v46 = vmul.f32 -1.442695, %v2929_v24  ;;  %v2254_v1 = vmul.f32 -1.442695, %v2945_v56 }
 0x834   :  { %v2253_v52 = vmul.f32 -1.442695, %v2930_v39 }
 0x835   :  { %3101 = vpow2.f32 %v2252_v46 }
 0x836   :  { %3103 = vpow2.f32 %v2253_v52 }
 0x837   :  { %3105 = vtanh.f32 %v2946_v60 }
 0x838   :  { %3107 = vpow2.f32 %v2254_v1 }
 0x83f   :  { %v3102_v4 = vpop.eup %3101 }
 0x840   :  { %v1846_v6 = vadd.f32 1.0, %v3102_v4  ;;  %v3104_v62 = vpop.eup %3103 }
 0x841   :  { %v1847_v14 = vadd.f32 1.0, %v3104_v62  ;;  %v3106_v26 = vpop.eup %3105 }
 0x842   :  { %3109 = vrcp.f32 %v1846_v6  ;;  %v3108_v27 = vpop.eup %3107 }
 0x843   :  { %3111 = vrcp.f32 %v1847_v14  ;;  %v1848_v37 = vadd.f32 1.0, %v3108_v27 }
 0x845   :  { %3113 = vrcp.f32 %v1848_v37 }
 0x84c   :  { %v3110_v16 = vpop.eup %3109 }
 0x84d   :  { %v1857_v30 = vmul.f32 %v3110_v16, %v3106_v26  ;;  %v3112_v32 = vpop.eup %3111 }
 0x84e   :  { %v1856_v41 = vmul.f32 %v3112_v32, %v3753_v43  ;;  %v1892_v43 = vld [vmem:[#allocation8 + $0xc0] sm:$0xff] }
 0x84f   :  { %v3114_v44 = vpop.eup %3113  ;;  %v2898_v45 = vpack.c.bf16 %v1897_v59, %v1892_v43 }
 0x850   :  { %v1858_v36 = vadd.f32 %v1857_v30, %v1856_v41 }
 0x852   :  { %3115 = vtanh.f32 %v1858_v36 }
 0x85c   :  { %v3116_v17 = vpop.eup %3115 }
 0x85d   :  { %v1860_v49 = vmul.f32 %v3116_v17, %v3114_v44 }
 0x85f   :  { %v1867_v51 = vmax.f32 %v1860_v49, 0.0 }
 0x861   :  { %2040 = vmatmul.mubr.f32.vlgmr.msra.gmra.mrb[16].mxu0 %v1867_v51  ;;  %2111 = vmatmul.mubr.f32.vlgmr.msra.gmra.mrb[16].mxu1 %v1867_v51 }
 0x862   :  { %2893 = vmatpush3.bf16.msra.mxu0 %v2892_v21  ;;  %2304 = vmatprep.mubr.msk.f32.mxu0 %vm3197_vm1, %v3195_v0  ;;  %v1922_v0 = vld [vmem:[#allocation8 + $0x1b0] sm:$0xff] }
 0x863   :  { %2894 = vmatprep.subr.bf16.mxu0 %v3196_v11  ;;  %v2907_v25 = vpack.c.bf16 %v1927_v22, %v1922_v0 }
 0x866   :  { %2896 = vmatpush3.bf16.msra.mxu0 %v2895_v57 }
 0x867   :  { %2897 = vmatprep.subr.bf16.mxu0 %v3196_v11 }
 0x86a   :  { %2899 = vmatpush3.bf16.msra.mxu0 %v2898_v45 }
 0x86b   :  { %2900 = vmatprep.subr.bf16.mxu0 %v3196_v11 }
 0x86e   :  { %2902 = vmatpush3.bf16.msra.mxu0 %v2901_v7 }
 0x86f   :  { %2903 = vmatprep.subr.bf16.mxu0 %v3196_v11 }
 0x872   :  { %2905 = vmatpush3.bf16.msra.mxu0 %v2904_v23 }
 0x873   :  { %2906 = vmatprep.subr.bf16.mxu0 %v3196_v11 }
 0x876   :  { %2908 = vmatpush3.bf16.msra.mxu0 %v2907_v25 }
 0x877   :  { %2909 = vmatprep.subr.bf16.mxu0 %v3196_v11 }
 0x87a   :  { %2911 = vmatpush3.bf16.msra.mxu0 %v2910_v35 }
 0x87b   :  { %2912 = vmatprep.subr.bf16.mxu0 %v3196_v11 }
 0x87e   :  { %2914 = vmatpush3.bf16.msra.mxu0 %v2913_v47 }
 0x881   :  { %2305 = vmatmul.mubr.f32.vlgmr.msra.gmra.mrb[18].mxu0 %v1867_v51 }
 0x934   :  { %v2041_v5 = vpop.f32.mrb[16].mxu0  ;;  %v2112_v8 = vpop.f32.mrb[16].mxu1 }
 0x935   :  { %v2042_v11 = vadd.f32 %v2041_v5, %v1953_v54  ;;  %v2113_v15 = vadd.f32 %v2112_v8, %v1961_v58  ;;  %v2043_v19 = vpop.f32.mrb[17].mxu0  ;;  %v2114_v24 = vpop.f32.mrb[17].mxu1 }
 0x936   :  { %v2044_v28 = vadd.f32 %v2043_v19, %v1957_v61  ;;  %v2115_v33 = vadd.f32 %v2114_v24, %v1965_v2 }
 0x937   :  { %2187 = vst [vmem:[#allocation10] sm:$0xff] %v2042_v11  ;;  %2189 = vst [vmem:[#allocation10 + $0x10] sm:$0xff] %v2113_v15 }
 0x938   :  { %2188 = vst [vmem:[#allocation10 + $0x8] sm:$0xff] %v2044_v28  ;;  %2190 = vst [vmem:[#allocation10 + $0x18] sm:$0xff] %v2115_v33 }
 0x954   :  { %v2183_v13 = vpop.f32.mrb[18].mxu0 }
 0x955   :  { %v2184_v39 = vadd.f32 %v2183_v13, %v1969_v20  ;;  %v2306_v40 = vpop.f32.mrb[19].mxu0 }
 0x957   :  { %2191 = vst [vmem:[#allocation10 + $0x20] sm:$0xff] %v2184_v39 }
 0x958   :  { %3172 = shalt.err (!%p3169_p6)
}
 0x959   :  { %s3173_s10 = scalar_lea.hbm %s3802_s6, 640 }
 0x95a   :  { %p3174_p7 = scmp.ne.s32.totalorder %s3802_s6, %s3173_s10  ;;  %p3177_p8 = scmp.lt.u32.totalorder %s3173_s10, %s3802_s6 }
 0x95c   :  { %p3179_p9 = pnand %p3177_p8, %p3174_p7 }
 0x95e   :  { %3182 = shalt.err (!%p3179_p9)
}
 0x95f   :  { %2201 = dma.vmem_to_hbm [thread:$0]  %s2199_s30, 640, %s3802_s6, [#allocation7]  }
 0x960   :  { %3187 = dma.done.wait [#allocation7], 640  }
 0x961   :  { %3188 = vsyncadd [#allocation7], 4294966656 }
 0x962   :  { %2205 = vsyncpa [#allocation6], 1 }
 0x963   :  { %2206 = vsyncpa [#allocation9], 1 }
 0x964   :  { %2207 = vsyncpa [#allocation7], 1 }

</bundles_post_ra>
